<compile_context>
chip_gen: v7x
topology: tpu7x:2x2x1
jax: 0.10.0
libtpu: 0.0.40
codegen_flags: <defaults>
</compile_context>

<pallas_src>
import jax
import jax.numpy as jnp
import numpy as np
from jax.experimental import pallas as pl
from jax.experimental.pallas import tpu as pltpu

HIDDEN_PAD = 128  # lane-aligned padded hidden size


def _lstm_tagger_kernel(ids_ref, emb_proj_ref, w_hh_ref, w_out_ref, b_out_ref, out_ref):
    """Full LSTM recurrence + hidden2tag + log_softmax on-chip.

    ids_ref      : (T,)            SMEM  (scalar-prefetched token ids)
    emb_proj_ref : (Vp, 4*Hp)      VMEM  (precomputed per-token gate pre-activations)
    w_hh_ref     : (Hp, 4*Hp)      VMEM
    w_out_ref    : (Hp, Tag)       VMEM
    b_out_ref    : (1, Tag)        VMEM
    out_ref      : (T, Tag)        VMEM
    """
    T = out_ref.shape[0]
    Hp = w_hh_ref.shape[0]

    # Hoist the recurrent weight into vregs once (not re-loaded every unrolled step).
    w_hh = w_hh_ref[...]                                   # (Hp, 4Hp)

    h = jnp.zeros((1, Hp), jnp.float32)                    # init_hidden() == zeros
    c = jnp.zeros((1, Hp), jnp.float32)

    hs = []
    for t in range(T):
        # Gather this token's precomputed input projection (x_t @ W_ih^T + b) from the table.
        gin = emb_proj_ref[pl.ds(ids_ref[t], 1), :]        # (1, 4Hp)
        gates = gin + jnp.dot(h, w_hh, preferred_element_type=jnp.float32)

        # Two full-width EUP calls, then lane-aligned 128-wide slices (gate order i, f, g, o).
        sig = jax.nn.sigmoid(gates)
        tng = jnp.tanh(gates)
        i_g = sig[:, 0:Hp]
        f_g = sig[:, Hp:2 * Hp]
        g_g = tng[:, 2 * Hp:3 * Hp]
        o_g = sig[:, 3 * Hp:4 * Hp]

        c = f_g * c + i_g * g_g
        h = o_g * jnp.tanh(c)
        hs.append(h)

    # Epilogue: hidden2tag + log_softmax (dim=1) over all timesteps, single output write.
    h_all = jnp.concatenate(hs, axis=0)                    # (T, Hp), register-resident rows
    logits = (jnp.dot(h_all, w_out_ref[...], preferred_element_type=jnp.float32)
              + b_out_ref[...])                            # (T, Tag)
    m = jnp.max(logits, axis=-1, keepdims=True)
    shifted = logits - m
    lse = jnp.log(jnp.sum(jnp.exp(shifted), axis=-1, keepdims=True))
    out_ref[...] = shifted - lse


def prepare_params(emb_table, w_ih, w_hh, b_ih, b_hh, w_out, b_out, hidden_pad=HIDDEN_PAD):
    """One-time layout prep: fold embedding+input projection into a table, pad H -> Hp=128."""
    H4, E = w_ih.shape
    H = H4 // 4
    Tag = w_out.shape[0]
    Hp = max(hidden_pad, H)

    def pad_gate_cols(m):  # (rows, 4H) -> (rows, 4Hp), each gate block zero-padded to Hp lanes
        blocks = jnp.split(jnp.asarray(m, jnp.float32), 4, axis=1)
        blocks = [jnp.pad(blk, ((0, 0), (0, Hp - H))) for blk in blocks]
        return jnp.concatenate(blocks, axis=1)

    w_ih_t_p = pad_gate_cols(jnp.asarray(w_ih).T)                       # (E, 4Hp)
    b_p = pad_gate_cols((jnp.asarray(b_ih) + jnp.asarray(b_hh)).reshape(1, 4 * H))  # (1, 4Hp)

    # Per-token gate pre-activations: emb_table @ W_ih^T + (b_ih + b_hh).  One-time prep,
    # so use HIGHEST precision here; padded lanes are exactly zero.
    emb_proj = jnp.dot(jnp.asarray(emb_table, jnp.float32), w_ih_t_p,
                       precision=jax.lax.Precision.HIGHEST) + b_p       # (V, 4Hp)
    V = emb_proj.shape[0]
    Vp = ((V + 7) // 8) * 8
    emb_proj = jnp.pad(emb_proj, ((0, Vp - V), (0, 0)))                 # sublane-aligned rows

    w_hh_t_p = pad_gate_cols(jnp.asarray(w_hh).T)                       # (H, 4Hp)
    w_hh_t_p = jnp.pad(w_hh_t_p, ((0, Hp - H), (0, 0)))                 # (Hp, 4Hp)

    w_out_t_p = jnp.pad(jnp.asarray(w_out, jnp.float32).T, ((0, Hp - H), (0, 0)))  # (Hp, Tag)
    b_out2 = jnp.asarray(b_out, jnp.float32).reshape(1, Tag)            # (1, Tag)
    return emb_proj, w_hh_t_p, w_out_t_p, b_out2


@jax.jit
def lstm_tagger_forward(sentence, emb_proj, w_hh_t_p, w_out_t_p, b_out2):
    """Single pallas_call: token ids scalar-prefetched to SMEM, all weights resident in VMEM."""
    T = sentence.shape[0]
    Tag = w_out_t_p.shape[1]
    vmem = pl.BlockSpec(memory_space=pltpu.MemorySpace.VMEM)

    return pl.pallas_call(
        _lstm_tagger_kernel,
        out_shape=jax.ShapeDtypeStruct((T, Tag), jnp.float32),
        grid_spec=pltpu.PrefetchScalarGridSpec(
            num_scalar_prefetch=1,          # sentence ids -> SMEM, passed as first kernel ref
            grid=(),
            in_specs=[vmem, vmem, vmem, vmem],
            out_specs=vmem,
        ),
    )(sentence, emb_proj, w_hh_t_p, w_out_t_p, b_out2)


def _reference_forward(sentence, emb_table, w_ih, w_hh, b_ih, b_hh, w_out, b_out, hidden_dim):
    """Pure-JAX reference mirroring PyTorch nn.LSTM semantics (unpadded params)."""
    embeds = jnp.take(emb_table, sentence, axis=0)
    H = hidden_dim

    def cell(carry, x_t):
        h, c = carry
        gates = x_t @ w_ih.T + h @ w_hh.T + b_ih + b_hh
        i = jax.nn.sigmoid(gates[0:H])
        f = jax.nn.sigmoid(gates[H:2 * H])
        g = jnp.tanh(gates[2 * H:3 * H])
        o = jax.nn.sigmoid(gates[3 * H:4 * H])
        c_new = f * c + i * g
        h_new = o * jnp.tanh(c_new)
        return (h_new, c_new), h_new

    h0 = jnp.zeros((H,), jnp.float32)
    c0 = jnp.zeros((H,), jnp.float32)
    _, hs = jax.lax.scan(cell, (h0, c0), embeds)
    tag_space = hs @ w_out.T + b_out
    return jax.nn.log_softmax(tag_space, axis=1)


if __name__ == "__main__":
    # Small shapes consistent with the module's forward (single sentence, batch = 1).
    EMBEDDING_DIM = 32
    HIDDEN_DIM = 32
    VOCAB_SIZE = 12
    TAGSET_SIZE = 8
    SEQ_LEN = 8

    key = jax.random.PRNGKey(0)
    keys = jax.random.split(key, 8)
    bound = 1.0 / np.sqrt(HIDDEN_DIM)

    emb_table = jax.random.normal(keys[0], (VOCAB_SIZE, EMBEDDING_DIM), jnp.float32)
    w_ih = jax.random.uniform(keys[1], (4 * HIDDEN_DIM, EMBEDDING_DIM), jnp.float32, -bound, bound)
    w_hh = jax.random.uniform(keys[2], (4 * HIDDEN_DIM, HIDDEN_DIM), jnp.float32, -bound, bound)
    b_ih = jax.random.uniform(keys[3], (4 * HIDDEN_DIM,), jnp.float32, -bound, bound)
    b_hh = jax.random.uniform(keys[4], (4 * HIDDEN_DIM,), jnp.float32, -bound, bound)
    w_out = jax.random.uniform(keys[5], (TAGSET_SIZE, HIDDEN_DIM), jnp.float32, -bound, bound)
    b_out = jax.random.uniform(keys[6], (TAGSET_SIZE,), jnp.float32, -bound, bound)

    sentence = jax.random.randint(keys[7], (SEQ_LEN,), 0, VOCAB_SIZE, dtype=jnp.int32)

    # One-time parameter layout prep (embedding+input projection folded, H padded to 128).
    emb_proj, w_hh_t_p, w_out_t_p, b_out2 = prepare_params(
        emb_table, w_ih, w_hh, b_ih, b_hh, w_out, b_out)

    tag_scores = lstm_tagger_forward(sentence, emb_proj, w_hh_t_p, w_out_t_p, b_out2)
    tag_scores = jax.block_until_ready(tag_scores)

    ref = _reference_forward(
        sentence, emb_table, w_ih, w_hh, b_ih, b_hh, w_out, b_out, HIDDEN_DIM)
    np.testing.assert_allclose(np.asarray(tag_scores), np.asarray(ref),
                               rtol=1e-5, atol=1e-5)

    print("KERNEL_OK")
</pallas_src>

<mosaic_0001>
module attributes {stable_mosaic.version = 11 : i64} {
  func.func @_lstm_tagger_kernel(%arg0: memref<8xi32, #tpu.memory_space<smem>>, %arg1: memref<16x512xf32, #tpu.memory_space<vmem>>, %arg2: memref<128x512xf32, #tpu.memory_space<vmem>>, %arg3: memref<128x8xf32, #tpu.memory_space<vmem>>, %arg4: memref<1x8xf32, #tpu.memory_space<vmem>>, %arg5: memref<8x8xf32, #tpu.memory_space<vmem>>) attributes {dimension_semantics = [], scalar_prefetch = 1 : i64, scratch_operands = 0 : i64, tpu.core_type = #tpu.core_type<tc>} {
    %c0 = arith.constant 0 : index
    %c0_0 = arith.constant 0 : index
    %0 = vector.load %arg2[%c0, %c0_0] : memref<128x512xf32, #tpu.memory_space<vmem>>, vector<128x512xf32>
    %cst = arith.constant 0.000000e+00 : f32
    %1 = vector.broadcast %cst : f32 to vector<1x128xf32>
    %cst_1 = arith.constant 0.000000e+00 : f32
    %2 = vector.broadcast %cst_1 : f32 to vector<1x128xf32>
    %c0_2 = arith.constant 0 : index
    %3 = memref.load %arg0[%c0_2] : memref<8xi32, #tpu.memory_space<smem>>
    %4 = arith.index_cast %3 : i32 to index
    %c0_3 = arith.constant 0 : index
    %5 = vector.load %arg1[%4, %c0_3] : memref<16x512xf32, #tpu.memory_space<vmem>>, vector<1x512xf32>
    %cst_4 = arith.constant dense<0.000000e+00> : vector<1x512xf32>
    %6 = tpu.matmul %1, %0, %cst_4 {dimension_numbers = #tpu.dot_dimension_numbers<[1], [0], [0], [1], [0, 0, 1, 1], [], []>} : vector<1x128xf32>, vector<128x512xf32>, vector<1x512xf32> -> vector<1x512xf32>
    %7 = arith.addf %5, %6 : vector<1x512xf32>
    %8 = arith.negf %7 : vector<1x512xf32>
    %9 = math.exp %8 : vector<1x512xf32>
    %cst_5 = arith.constant 1.000000e+00 : f32
    %10 = vector.broadcast %cst_5 : f32 to vector<1x512xf32>
    %11 = arith.addf %10, %9 : vector<1x512xf32>
    %12 = arith.divf %10, %11 : vector<1x512xf32>
    %13 = math.tanh %7 : vector<1x512xf32>
    %14 = vector.extract_strided_slice %12 {offsets = [0, 0], sizes = [1, 128], strides = [1, 1]} : vector<1x512xf32> to vector<1x128xf32>
    %15 = vector.extract_strided_slice %12 {offsets = [0, 128], sizes = [1, 128], strides = [1, 1]} : vector<1x512xf32> to vector<1x128xf32>
    %16 = vector.extract_strided_slice %13 {offsets = [0, 256], sizes = [1, 128], strides = [1, 1]} : vector<1x512xf32> to vector<1x128xf32>
    %17 = vector.extract_strided_slice %12 {offsets = [0, 384], sizes = [1, 128], strides = [1, 1]} : vector<1x512xf32> to vector<1x128xf32>
    %18 = arith.mulf %15, %2 : vector<1x128xf32>
    %19 = arith.mulf %14, %16 : vector<1x128xf32>
    %20 = arith.addf %18, %19 : vector<1x128xf32>
    %21 = math.tanh %20 : vector<1x128xf32>
    %22 = arith.mulf %17, %21 : vector<1x128xf32>
    %c1 = arith.constant 1 : index
    %23 = memref.load %arg0[%c1] : memref<8xi32, #tpu.memory_space<smem>>
    %24 = arith.index_cast %23 : i32 to index
    %c0_6 = arith.constant 0 : index
    %25 = vector.load %arg1[%24, %c0_6] : memref<16x512xf32, #tpu.memory_space<vmem>>, vector<1x512xf32>
    %cst_7 = arith.constant dense<0.000000e+00> : vector<1x512xf32>
    %26 = tpu.matmul %22, %0, %cst_7 {dimension_numbers = #tpu.dot_dimension_numbers<[1], [0], [0], [1], [0, 0, 1, 1], [], []>} : vector<1x128xf32>, vector<128x512xf32>, vector<1x512xf32> -> vector<1x512xf32>
    %27 = arith.addf %25, %26 : vector<1x512xf32>
    %28 = arith.negf %27 : vector<1x512xf32>
    %29 = math.exp %28 : vector<1x512xf32>
    %cst_8 = arith.constant 1.000000e+00 : f32
    %30 = vector.broadcast %cst_8 : f32 to vector<1x512xf32>
    %31 = arith.addf %30, %29 : vector<1x512xf32>
    %32 = arith.divf %30, %31 : vector<1x512xf32>
    %33 = math.tanh %27 : vector<1x512xf32>
    %34 = vector.extract_strided_slice %32 {offsets = [0, 0], sizes = [1, 128], strides = [1, 1]} : vector<1x512xf32> to vector<1x128xf32>
    %35 = vector.extract_strided_slice %32 {offsets = [0, 128], sizes = [1, 128], strides = [1, 1]} : vector<1x512xf32> to vector<1x128xf32>
    %36 = vector.extract_strided_slice %33 {offsets = [0, 256], sizes = [1, 128], strides = [1, 1]} : vector<1x512xf32> to vector<1x128xf32>
    %37 = vector.extract_strided_slice %32 {offsets = [0, 384], sizes = [1, 128], strides = [1, 1]} : vector<1x512xf32> to vector<1x128xf32>
    %38 = arith.mulf %35, %20 : vector<1x128xf32>
    %39 = arith.mulf %34, %36 : vector<1x128xf32>
    %40 = arith.addf %38, %39 : vector<1x128xf32>
    %41 = math.tanh %40 : vector<1x128xf32>
    %42 = arith.mulf %37, %41 : vector<1x128xf32>
    %c2 = arith.constant 2 : index
    %43 = memref.load %arg0[%c2] : memref<8xi32, #tpu.memory_space<smem>>
    %44 = arith.index_cast %43 : i32 to index
    %c0_9 = arith.constant 0 : index
    %45 = vector.load %arg1[%44, %c0_9] : memref<16x512xf32, #tpu.memory_space<vmem>>, vector<1x512xf32>
    %cst_10 = arith.constant dense<0.000000e+00> : vector<1x512xf32>
    %46 = tpu.matmul %42, %0, %cst_10 {dimension_numbers = #tpu.dot_dimension_numbers<[1], [0], [0], [1], [0, 0, 1, 1], [], []>} : vector<1x128xf32>, vector<128x512xf32>, vector<1x512xf32> -> vector<1x512xf32>
    %47 = arith.addf %45, %46 : vector<1x512xf32>
    %48 = arith.negf %47 : vector<1x512xf32>
    %49 = math.exp %48 : vector<1x512xf32>
    %cst_11 = arith.constant 1.000000e+00 : f32
    %50 = vector.broadcast %cst_11 : f32 to vector<1x512xf32>
    %51 = arith.addf %50, %49 : vector<1x512xf32>
    %52 = arith.divf %50, %51 : vector<1x512xf32>
    %53 = math.tanh %47 : vector<1x512xf32>
    %54 = vector.extract_strided_slice %52 {offsets = [0, 0], sizes = [1, 128], strides = [1, 1]} : vector<1x512xf32> to vector<1x128xf32>
    %55 = vector.extract_strided_slice %52 {offsets = [0, 128], sizes = [1, 128], strides = [1, 1]} : vector<1x512xf32> to vector<1x128xf32>
    %56 = vector.extract_strided_slice %53 {offsets = [0, 256], sizes = [1, 128], strides = [1, 1]} : vector<1x512xf32> to vector<1x128xf32>
    %57 = vector.extract_strided_slice %52 {offsets = [0, 384], sizes = [1, 128], strides = [1, 1]} : vector<1x512xf32> to vector<1x128xf32>
    %58 = arith.mulf %55, %40 : vector<1x128xf32>
    %59 = arith.mulf %54, %56 : vector<1x128xf32>
    %60 = arith.addf %58, %59 : vector<1x128xf32>
    %61 = math.tanh %60 : vector<1x128xf32>
    %62 = arith.mulf %57, %61 : vector<1x128xf32>
    %c3 = arith.constant 3 : index
    %63 = memref.load %arg0[%c3] : memref<8xi32, #tpu.memory_space<smem>>
    %64 = arith.index_cast %63 : i32 to index
    %c0_12 = arith.constant 0 : index
    %65 = vector.load %arg1[%64, %c0_12] : memref<16x512xf32, #tpu.memory_space<vmem>>, vector<1x512xf32>
    %cst_13 = arith.constant dense<0.000000e+00> : vector<1x512xf32>
    %66 = tpu.matmul %62, %0, %cst_13 {dimension_numbers = #tpu.dot_dimension_numbers<[1], [0], [0], [1], [0, 0, 1, 1], [], []>} : vector<1x128xf32>, vector<128x512xf32>, vector<1x512xf32> -> vector<1x512xf32>
    %67 = arith.addf %65, %66 : vector<1x512xf32>
    %68 = arith.negf %67 : vector<1x512xf32>
    %69 = math.exp %68 : vector<1x512xf32>
    %cst_14 = arith.constant 1.000000e+00 : f32
    %70 = vector.broadcast %cst_14 : f32 to vector<1x512xf32>
    %71 = arith.addf %70, %69 : vector<1x512xf32>
    %72 = arith.divf %70, %71 : vector<1x512xf32>
    %73 = math.tanh %67 : vector<1x512xf32>
    %74 = vector.extract_strided_slice %72 {offsets = [0, 0], sizes = [1, 128], strides = [1, 1]} : vector<1x512xf32> to vector<1x128xf32>
    %75 = vector.extract_strided_slice %72 {offsets = [0, 128], sizes = [1, 128], strides = [1, 1]} : vector<1x512xf32> to vector<1x128xf32>
    %76 = vector.extract_strided_slice %73 {offsets = [0, 256], sizes = [1, 128], strides = [1, 1]} : vector<1x512xf32> to vector<1x128xf32>
    %77 = vector.extract_strided_slice %72 {offsets = [0, 384], sizes = [1, 128], strides = [1, 1]} : vector<1x512xf32> to vector<1x128xf32>
    %78 = arith.mulf %75, %60 : vector<1x128xf32>
    %79 = arith.mulf %74, %76 : vector<1x128xf32>
    %80 = arith.addf %78, %79 : vector<1x128xf32>
    %81 = math.tanh %80 : vector<1x128xf32>
    %82 = arith.mulf %77, %81 : vector<1x128xf32>
    %c4 = arith.constant 4 : index
    %83 = memref.load %arg0[%c4] : memref<8xi32, #tpu.memory_space<smem>>
    %84 = arith.index_cast %83 : i32 to index
    %c0_15 = arith.constant 0 : index
    %85 = vector.load %arg1[%84, %c0_15] : memref<16x512xf32, #tpu.memory_space<vmem>>, vector<1x512xf32>
    %cst_16 = arith.constant dense<0.000000e+00> : vector<1x512xf32>
    %86 = tpu.matmul %82, %0, %cst_16 {dimension_numbers = #tpu.dot_dimension_numbers<[1], [0], [0], [1], [0, 0, 1, 1], [], []>} : vector<1x128xf32>, vector<128x512xf32>, vector<1x512xf32> -> vector<1x512xf32>
    %87 = arith.addf %85, %86 : vector<1x512xf32>
    %88 = arith.negf %87 : vector<1x512xf32>
    %89 = math.exp %88 : vector<1x512xf32>
    %cst_17 = arith.constant 1.000000e+00 : f32
    %90 = vector.broadcast %cst_17 : f32 to vector<1x512xf32>
    %91 = arith.addf %90, %89 : vector<1x512xf32>
    %92 = arith.divf %90, %91 : vector<1x512xf32>
    %93 = math.tanh %87 : vector<1x512xf32>
    %94 = vector.extract_strided_slice %92 {offsets = [0, 0], sizes = [1, 128], strides = [1, 1]} : vector<1x512xf32> to vector<1x128xf32>
    %95 = vector.extract_strided_slice %92 {offsets = [0, 128], sizes = [1, 128], strides = [1, 1]} : vector<1x512xf32> to vector<1x128xf32>
    %96 = vector.extract_strided_slice %93 {offsets = [0, 256], sizes = [1, 128], strides = [1, 1]} : vector<1x512xf32> to vector<1x128xf32>
    %97 = vector.extract_strided_slice %92 {offsets = [0, 384], sizes = [1, 128], strides = [1, 1]} : vector<1x512xf32> to vector<1x128xf32>
    %98 = arith.mulf %95, %80 : vector<1x128xf32>
    %99 = arith.mulf %94, %96 : vector<1x128xf32>
    %100 = arith.addf %98, %99 : vector<1x128xf32>
    %101 = math.tanh %100 : vector<1x128xf32>
    %102 = arith.mulf %97, %101 : vector<1x128xf32>
    %c5 = arith.constant 5 : index
    %103 = memref.load %arg0[%c5] : memref<8xi32, #tpu.memory_space<smem>>
    %104 = arith.index_cast %103 : i32 to index
    %c0_18 = arith.constant 0 : index
    %105 = vector.load %arg1[%104, %c0_18] : memref<16x512xf32, #tpu.memory_space<vmem>>, vector<1x512xf32>
    %cst_19 = arith.constant dense<0.000000e+00> : vector<1x512xf32>
    %106 = tpu.matmul %102, %0, %cst_19 {dimension_numbers = #tpu.dot_dimension_numbers<[1], [0], [0], [1], [0, 0, 1, 1], [], []>} : vector<1x128xf32>, vector<128x512xf32>, vector<1x512xf32> -> vector<1x512xf32>
    %107 = arith.addf %105, %106 : vector<1x512xf32>
    %108 = arith.negf %107 : vector<1x512xf32>
    %109 = math.exp %108 : vector<1x512xf32>
    %cst_20 = arith.constant 1.000000e+00 : f32
    %110 = vector.broadcast %cst_20 : f32 to vector<1x512xf32>
    %111 = arith.addf %110, %109 : vector<1x512xf32>
    %112 = arith.divf %110, %111 : vector<1x512xf32>
    %113 = math.tanh %107 : vector<1x512xf32>
    %114 = vector.extract_strided_slice %112 {offsets = [0, 0], sizes = [1, 128], strides = [1, 1]} : vector<1x512xf32> to vector<1x128xf32>
    %115 = vector.extract_strided_slice %112 {offsets = [0, 128], sizes = [1, 128], strides = [1, 1]} : vector<1x512xf32> to vector<1x128xf32>
    %116 = vector.extract_strided_slice %113 {offsets = [0, 256], sizes = [1, 128], strides = [1, 1]} : vector<1x512xf32> to vector<1x128xf32>
    %117 = vector.extract_strided_slice %112 {offsets = [0, 384], sizes = [1, 128], strides = [1, 1]} : vector<1x512xf32> to vector<1x128xf32>
    %118 = arith.mulf %115, %100 : vector<1x128xf32>
    %119 = arith.mulf %114, %116 : vector<1x128xf32>
    %120 = arith.addf %118, %119 : vector<1x128xf32>
    %121 = math.tanh %120 : vector<1x128xf32>
    %122 = arith.mulf %117, %121 : vector<1x128xf32>
    %c6 = arith.constant 6 : index
    %123 = memref.load %arg0[%c6] : memref<8xi32, #tpu.memory_space<smem>>
    %124 = arith.index_cast %123 : i32 to index
    %c0_21 = arith.constant 0 : index
    %125 = vector.load %arg1[%124, %c0_21] : memref<16x512xf32, #tpu.memory_space<vmem>>, vector<1x512xf32>
    %cst_22 = arith.constant dense<0.000000e+00> : vector<1x512xf32>
    %126 = tpu.matmul %122, %0, %cst_22 {dimension_numbers = #tpu.dot_dimension_numbers<[1], [0], [0], [1], [0, 0, 1, 1], [], []>} : vector<1x128xf32>, vector<128x512xf32>, vector<1x512xf32> -> vector<1x512xf32>
    %127 = arith.addf %125, %126 : vector<1x512xf32>
    %128 = arith.negf %127 : vector<1x512xf32>
    %129 = math.exp %128 : vector<1x512xf32>
    %cst_23 = arith.constant 1.000000e+00 : f32
    %130 = vector.broadcast %cst_23 : f32 to vector<1x512xf32>
    %131 = arith.addf %130, %129 : vector<1x512xf32>
    %132 = arith.divf %130, %131 : vector<1x512xf32>
    %133 = math.tanh %127 : vector<1x512xf32>
    %134 = vector.extract_strided_slice %132 {offsets = [0, 0], sizes = [1, 128], strides = [1, 1]} : vector<1x512xf32> to vector<1x128xf32>
    %135 = vector.extract_strided_slice %132 {offsets = [0, 128], sizes = [1, 128], strides = [1, 1]} : vector<1x512xf32> to vector<1x128xf32>
    %136 = vector.extract_strided_slice %133 {offsets = [0, 256], sizes = [1, 128], strides = [1, 1]} : vector<1x512xf32> to vector<1x128xf32>
    %137 = vector.extract_strided_slice %132 {offsets = [0, 384], sizes = [1, 128], strides = [1, 1]} : vector<1x512xf32> to vector<1x128xf32>
    %138 = arith.mulf %135, %120 : vector<1x128xf32>
    %139 = arith.mulf %134, %136 : vector<1x128xf32>
    %140 = arith.addf %138, %139 : vector<1x128xf32>
    %141 = math.tanh %140 : vector<1x128xf32>
    %142 = arith.mulf %137, %141 : vector<1x128xf32>
    %c7 = arith.constant 7 : index
    %143 = memref.load %arg0[%c7] : memref<8xi32, #tpu.memory_space<smem>>
    %144 = arith.index_cast %143 : i32 to index
    %c0_24 = arith.constant 0 : index
    %145 = vector.load %arg1[%144, %c0_24] : memref<16x512xf32, #tpu.memory_space<vmem>>, vector<1x512xf32>
    %cst_25 = arith.constant dense<0.000000e+00> : vector<1x512xf32>
    %146 = tpu.matmul %142, %0, %cst_25 {dimension_numbers = #tpu.dot_dimension_numbers<[1], [0], [0], [1], [0, 0, 1, 1], [], []>} : vector<1x128xf32>, vector<128x512xf32>, vector<1x512xf32> -> vector<1x512xf32>
    %147 = arith.addf %145, %146 : vector<1x512xf32>
    %148 = arith.negf %147 : vector<1x512xf32>
    %149 = math.exp %148 : vector<1x512xf32>
    %cst_26 = arith.constant 1.000000e+00 : f32
    %150 = vector.broadcast %cst_26 : f32 to vector<1x512xf32>
    %151 = arith.addf %150, %149 : vector<1x512xf32>
    %152 = arith.divf %150, %151 : vector<1x512xf32>
    %153 = math.tanh %147 : vector<1x512xf32>
    %154 = vector.extract_strided_slice %152 {offsets = [0, 0], sizes = [1, 128], strides = [1, 1]} : vector<1x512xf32> to vector<1x128xf32>
    %155 = vector.extract_strided_slice %152 {offsets = [0, 128], sizes = [1, 128], strides = [1, 1]} : vector<1x512xf32> to vector<1x128xf32>
    %156 = vector.extract_strided_slice %153 {offsets = [0, 256], sizes = [1, 128], strides = [1, 1]} : vector<1x512xf32> to vector<1x128xf32>
    %157 = vector.extract_strided_slice %152 {offsets = [0, 384], sizes = [1, 128], strides = [1, 1]} : vector<1x512xf32> to vector<1x128xf32>
    %158 = arith.mulf %155, %140 : vector<1x128xf32>
    %159 = arith.mulf %154, %156 : vector<1x128xf32>
    %160 = arith.addf %158, %159 : vector<1x128xf32>
    %161 = math.tanh %160 : vector<1x128xf32>
    %162 = arith.mulf %157, %161 : vector<1x128xf32>
    %163 = tpu.concatenate %22, %42, %62, %82, %102, %122, %142, %162 in 0 : vector<1x128xf32>, vector<1x128xf32>, vector<1x128xf32>, vector<1x128xf32>, vector<1x128xf32>, vector<1x128xf32>, vector<1x128xf32>, vector<1x128xf32> -> vector<8x128xf32>
    %c0_27 = arith.constant 0 : index
    %c0_28 = arith.constant 0 : index
    %164 = vector.load %arg3[%c0_27, %c0_28] : memref<128x8xf32, #tpu.memory_space<vmem>>, vector<128x8xf32>
    %cst_29 = arith.constant dense<0.000000e+00> : vector<8x8xf32>
    %165 = tpu.matmul %163, %164, %cst_29 {dimension_numbers = #tpu.dot_dimension_numbers<[1], [0], [0], [1], [0, 0, 1, 1], [], []>} : vector<8x128xf32>, vector<128x8xf32>, vector<8x8xf32> -> vector<8x8xf32>
    %c0_30 = arith.constant 0 : index
    %c0_31 = arith.constant 0 : index
    %166 = vector.load %arg4[%c0_30, %c0_31] : memref<1x8xf32, #tpu.memory_space<vmem>>, vector<1x8xf32>
    %167 = vector.broadcast %166 : vector<1x8xf32> to vector<8x8xf32>
    %168 = arith.addf %165, %167 : vector<8x8xf32>
    %cst_32 = arith.constant dense<0xFF800000> : vector<8xf32>
    %169 = vector.multi_reduction <maximumf>, %168, %cst_32 [1] : vector<8x8xf32> to vector<8xf32>
    %170 = vector.shape_cast %169 : vector<8xf32> to vector<8x1xf32>
    %171 = vector.broadcast %170 : vector<8x1xf32> to vector<8x8xf32>
    %172 = arith.subf %168, %171 : vector<8x8xf32>
    %173 = math.exp %172 : vector<8x8xf32>
    %cst_33 = arith.constant dense<0.000000e+00> : vector<8xf32>
    %174 = vector.multi_reduction <add>, %173, %cst_33 [1] : vector<8x8xf32> to vector<8xf32>
    %175 = vector.shape_cast %174 : vector<8xf32> to vector<8x1xf32>
    %176 = math.log %175 : vector<8x1xf32>
    %177 = vector.broadcast %176 : vector<8x1xf32> to vector<8x8xf32>
    %178 = arith.subf %172, %177 : vector<8x8xf32>
    %c0_34 = arith.constant 0 : index
    %c0_35 = arith.constant 0 : index
    %179 = vector.load %arg5[%c0_34, %c0_35] : memref<8x8xf32, #tpu.memory_space<vmem>>, vector<8x8xf32>
    tpu.vector_store %arg5[%c0_34, %c0_35], %178 {strides = array<i32>} : memref<8x8xf32, #tpu.memory_space<vmem>>, vector<8x8xf32>,
    return
  }
}

</mosaic_0001>

<bundles_post_ra>
// kernel: lstm_tagger_forward.1
= control target key start
LH: loop header
LB: loop body
LE: loop exit
PB: predicated region body
PF: predicated region fallthrough
CT: control target
= control target key end

     0   :  { %s3263_s0 = inlined_call_operand.vmem [shape: s32[8], index: 0, kind: input, shape index: {}]   ;;  %s3264_s1 = inlined_call_operand.vmem [shape: f32[16,512], index: 1, kind: input, shape index: {}]   ;;  %s3265_s2 = inlined_call_operand.hbm [shape: f32[128,512], index: 2, kind: input, shape index: {}]   ;;  %s3266_s3 = inlined_call_operand.vmem [shape: f32[128,8], index: 3, kind: input, shape index: {}]   ;;  %s3267_s4 = inlined_call_operand.vmem [shape: f32[1,8], index: 4, kind: input, shape index: {}]   ;;  %s3268_s5 = inlined_call_operand.hbm [shape: f32[8,8], index: 5, kind: output, shape index: {}]  }
   0x1   :  { %s10_s20 = sshll.u32 %s3263_s0, 4  ;;  %s11_s20 = int_to_ptr.vmem [resolvable:$true] %s10_s20 }
   0x2   :  { %s2626_s21 = scalar_lea.vmem %s11_s20, 16  ;;  %p2631_p1 = scmp.lt.s32.totalorder %s11_s20, %s11_s20 }
   0x3   :  { %p2627_p0 = scmp.ne.s32.totalorder %s11_s20, %s2626_s21  ;;  %p2632_p2 = scmp.lt.s32.totalorder %s2626_s21, %s2626_s21 }
   0x5   :  { %p2633_p3 = por %p2632_p2, %p2631_p1 }
   0x7   :  { %p2634_p4 = pnand %p2633_p3, %p2627_p0 }
   0x9   :  { %2637 = shalt.err (!%p2634_p4)  }
   0xa   :  { %s2688_s22 = smov [#allocation3]  }
   0xb   :  { %13 = dma.vmem_to_smem %s11_s20, 16, %s2688_s22, [#allocation2] }
   0xc   :  { %2682 = dma.done.wait [#allocation2], 16 }
   0xd   :  { %2683 = vsyncadd [#allocation2], 4294967280 }
   0xe   :  { %15 = sfence }
   0xf   :  { %16 = vsyncpa [#allocation5], 0 }
  0x10   :  { %17 = vsyncpa [#allocation6], 0  ;;  %s2689_s23 = smov [#allocation4]   ;;  %s2638_s26 = scalar_lea.hbm %s3265_s2, 8192 }
  0x11   :  { %s25_s24 = sshll.u32 %s2689_s23, 4  ;;  %p2639_p5 = scmp.ne.s32.totalorder %s3265_s2, %s2638_s26  ;;  %s26_s24 = int_to_ptr.vmem [resolvable:$true] %s25_s24 }
  0x12   :  { %p2642_p6 = scmp.lt.u32.totalorder %s2638_s26, %s3265_s2 }
  0x14   :  { %p2644_p7 = pnand %p2642_p6, %p2639_p5 }
  0x16   :  { %2647 = shalt.err (!%p2644_p7)
}
  0x17   :  { %s2648_s6 = scalar_lea.vmem %s26_s24, 8192  ;;  %p2653_p9 = scmp.lt.s32.totalorder %s26_s24, %s26_s24 }
  0x18   :  { %p2649_p8 = scmp.ne.s32.totalorder %s26_s24, %s2648_s6  ;;  %p2654_p10 = scmp.lt.s32.totalorder %s2648_s6, %s2648_s6 }
  0x1a   :  { %p2655_p11 = por %p2654_p10, %p2653_p9 }
  0x1c   :  { %p2656_p12 = pnand %p2655_p11, %p2649_p8 }
  0x1e   :  { %2659 = shalt.err (!%p2656_p12)
}
  0x1f   :  { %s2690_s7 = smov 512   ;;  %s2691_s8 = smov 32  }
  0x20   :  { %31 = dma.hbm_to_vmem [thread:$0]  %s3265_s2, 8192, %s26_s24, [#allocation5], %s2690_s7, %s2690_s7, %s2691_s8  }
  0x21   :  { %2684 = dma.done.wait [#allocation5], 8192  }
  0x22   :  { %2685 = vsyncadd [#allocation5], 4294959104  ;;  %v2692_v0 = vmov 0.0   ;;  %v40_v1 = vld [vmem:[#allocation4 + $0x8] sm:$0xff]  ;;  %v42_v3 = vld [vmem:[#allocation4 + $0x18] sm:$0xff]  ;;  %s103_s2 = sld [smem:[#allocation3]] }
  0x23   :  { %177 = vmatprep.mubr.f32.mxu0 %v2692_v0  ;;  %248 = vmatprep.mubr.f32.mxu1 %v2692_v0  ;;  %v44_v2 = vld [vmem:[#allocation4 + $0x28] sm:$0xff]  ;;  %v46_v5 = vld [vmem:[#allocation4 + $0x38] sm:$0xff]  ;;  %v39_v6 = vld [vmem:[#allocation4] sm:$0xff]  ;;  %s1924_s18 = sld [smem:[#allocation3 + $0x1]]  ;;  %s1928_s0 = sld [smem:[#allocation3 + $0x2]]  ;;  %vm1761_vm0 = vcmask 1040384  }
  0x24   :  { %v2744_v4 = vpack.c.bf16 %v44_v2, %v40_v1  ;;  %v43_v7 = vld [vmem:[#allocation4 + $0x20] sm:$0xff]  ;;  %v2746_v8 = vpack.c.bf16 %v46_v5, %v42_v3  ;;  %v41_v10 = vld [vmem:[#allocation4 + $0x10] sm:$0xff]  ;;  %v48_v12 = vld [vmem:[#allocation4 + $0x48] sm:$0xff]  ;;  %vm1763_vm1 = vcmask 1041408   ;;  %s1932_s8 = sld [smem:[#allocation3 + $0x3]]  ;;  %vm1765_vm2 = vcmask 1042432  }
  0x25   :  { %v2748_v9 = vpack.c.bf16 %v43_v7, %v39_v6  ;;  %v45_v11 = vld [vmem:[#allocation4 + $0x30] sm:$0xff]  ;;  %v52_v14 = vld [vmem:[#allocation4 + $0x68] sm:$0xff]  ;;  %v50_v15 = vld [vmem:[#allocation4 + $0x58] sm:$0xff]  ;;  %s1936_s15 = sld [smem:[#allocation3 + $0x4]]  ;;  %vm1767_vm3 = vcmask 1043456   ;;  %s1940_s23 = sld [smem:[#allocation3 + $0x5]] }
  0x26   :  { %2014 = vmatprep.subr.bf16.mxu0 %v2744_v4  ;;  %v2751_v13 = vpack.c.bf16 %v45_v11, %v41_v10  ;;  %v54_v16 = vld [vmem:[#allocation4 + $0x78] sm:$0xff]  ;;  %2046 = vmatprep.subr.bf16.mxu1 %v2746_v8  ;;  %v2755_v17 = vpack.c.bf16 %v52_v14, %v48_v12  ;;  %v47_v19 = vld [vmem:[#allocation4 + $0x40] sm:$0xff]  ;;  %v49_v21 = vld [vmem:[#allocation4 + $0x50] sm:$0xff]  ;;  %vm1769_vm4 = vcmask 1044480   ;;  %s1944_s30 = sld [smem:[#allocation3 + $0x6]]  ;;  %vm1771_vm5 = vcmask 1045504  }
  0x27   :  { %2016 = vmatpush1.bf16.msra.mxu0 %v2748_v9  ;;  %v2757_v18 = vpack.c.bf16 %v54_v16, %v50_v15  ;;  %v51_v20 = vld [vmem:[#allocation4 + $0x60] sm:$0xff]  ;;  %v53_v23 = vld [vmem:[#allocation4 + $0x70] sm:$0xff]  ;;  %v56_v24 = vld [vmem:[#allocation4 + $0x88] sm:$0xff]  ;;  %vm2695_vm6 = vmmov 0   ;;  %vm1773_vm7 = vcmask 1046528   ;;  %vm1868_vm8 = vcmask 64512  }
  0x28   :  { %2048 = vmatpush1.bf16.msra.mxu1 %v2751_v13  ;;  %v2760_v22 = vpack.c.bf16 %v51_v20, %v47_v19  ;;  %v60_v25 = vld [vmem:[#allocation4 + $0xa8] sm:$0xff]  ;;  %2018 = vmatprep.subr.bf16.mxu0 %v2755_v17  ;;  %v2764_v26 = vpack.c.bf16 %v53_v23, %v49_v21  ;;  %v58_v28 = vld [vmem:[#allocation4 + $0x98] sm:$0xff]  ;;  %v55_v30 = vld [vmem:[#allocation4 + $0x80] sm:$0xff]  ;;  %s104_s11 = sshra.s32 %s103_s2, 3  ;;  %s107_s12 = sand.u32 7, %s103_s2 }
  0x29   :  { %2050 = vmatprep.subr.bf16.mxu1 %v2757_v18  ;;  %v2766_v27 = vpack.c.bf16 %v60_v25, %v56_v24  ;;  %v62_v29 = vld [vmem:[#allocation4 + $0xb8] sm:$0xff]  ;;  %v59_v32 = vld [vmem:[#allocation4 + $0xa0] sm:$0xff]  ;;  %v57_v33 = vld [vmem:[#allocation4 + $0x90] sm:$0xff]  ;;  %s1953_s13 = sshll.u32 %s104_s11, 5  ;;  %s306_s19 = sshra.s32 %s1924_s18, 3 }
  0x2a   :  { %v2768_v31 = vpack.c.bf16 %v62_v29, %v58_v28  ;;  %v61_v34 = vld [vmem:[#allocation4 + $0xb0] sm:$0xff]  ;;  %v2771_v35 = vpack.c.bf16 %v59_v32, %v55_v30  ;;  %v64_v36 = vld [vmem:[#allocation4 + $0xc8] sm:$0xff]  ;;  %v66_v38 = vld [vmem:[#allocation4 + $0xd8] sm:$0xff]  ;;  %s110_s14 = sadd.s32 %s1953_s13, %s107_s12  ;;  %s309_s20 = sand.u32 7, %s1924_s18 }
  0x2b   :  { %2020 = vmatpush1.bf16.msra.mxu0 %v2760_v22  ;;  %v68_v37 = vld [vmem:[#allocation4 + $0xe8] sm:$0xff]  ;;  %v2775_v39 = vpack.c.bf16 %v61_v34, %v57_v33  ;;  %v70_v41 = vld [vmem:[#allocation4 + $0xf8] sm:$0xff]  ;;  %v63_v42 = vld [vmem:[#allocation4 + $0xc0] sm:$0xff]  ;;  %s111_s17 = scalar_lea.vmem %s3264_s1, %s110_s14  ;;  %s1954_s21 = sshll.u32 %s306_s19, 5 }
  0x2c   :  { %2052 = vmatpush1.bf16.msra.mxu1 %v2764_v26  ;;  %2022 = vmatprep.subr.bf16.mxu0 %v2766_v27  ;;  %v2777_v40 = vpack.c.bf16 %v68_v37, %v64_v36  ;;  %v67_v43 = vld [vmem:[#allocation4 + $0xe0] sm:$0xff]  ;;  %v2780_v44 = vpack.c.bf16 %v70_v41, %v66_v38  ;;  %v65_v45 = vld [vmem:[#allocation4 + $0xd0] sm:$0xff]  ;;  %v72_v47 = vld [vmem:[#allocation4 + $0x108] sm:$0xff]  ;;  %s312_s22 = sadd.s32 %s1954_s21, %s309_s20  ;;  %s508_s26 = sshra.s32 %s1928_s0, 3 }
  0x2d   :  { %2054 = vmatprep.subr.bf16.mxu1 %v2768_v31  ;;  %v69_v46 = vld [vmem:[#allocation4 + $0xf0] sm:$0xff]  ;;  %v76_v48 = vld [vmem:[#allocation4 + $0x128] sm:$0xff]  ;;  %v74_v49 = vld [vmem:[#allocation4 + $0x118] sm:$0xff]  ;;  %v2783_v51 = vpack.c.bf16 %v67_v43, %v63_v42  ;;  %s313_s25 = scalar_lea.vmem %s3264_s1, %s312_s22  ;;  %s511_s27 = sand.u32 7, %s1928_s0 }
  0x2e   :  { %v78_v50 = vld [vmem:[#allocation4 + $0x138] sm:$0xff]  ;;  %v2787_v52 = vpack.c.bf16 %v69_v46, %v65_v45  ;;  %v2789_v53 = vpack.c.bf16 %v76_v48, %v72_v47  ;;  %v71_v54 = vld [vmem:[#allocation4 + $0x100] sm:$0xff]  ;;  %v73_v56 = vld [vmem:[#allocation4 + $0x110] sm:$0xff]  ;;  %v2693_v48 = vmov 1966171168   ;;  %s1955_s28 = sshll.u32 %s508_s26, 5 }
  0x2f   :  { %2024 = vmatpush1.bf16.msra.mxu0 %v2771_v35  ;;  %v75_v55 = vld [vmem:[#allocation4 + $0x120] sm:$0xff]  ;;  %v2792_v57 = vpack.c.bf16 %v78_v50, %v74_v49  ;;  %v77_v58 = vld [vmem:[#allocation4 + $0x130] sm:$0xff]  ;;  %v80_v59 = vld [vmem:[#allocation4 + $0x148] sm:$0xff]  ;;  %v262_v49 = vunpack.c.l.s4 %v2693_v48  ;;  %v264_v50 = vlaneseq  ;;  %s514_s29 = sadd.s32 %s1955_s28, %s511_s27  ;;  %s710_s9 = sshra.s32 %s1932_s8, 3 }
  0x30   :  { %2056 = vmatpush1.bf16.msra.mxu1 %v2775_v39  ;;  %2026 = vmatprep.subr.bf16.mxu0 %v2777_v40  ;;  %v84_v60 = vld [vmem:[#allocation4 + $0x168] sm:$0xff]  ;;  %v82_v61 = vld [vmem:[#allocation4 + $0x158] sm:$0xff]  ;;  %v2795_v63 = vpack.c.bf16 %v75_v55, %v71_v54  ;;  %v2799_v1 = vpack.c.bf16 %v77_v58, %v73_v56  ;;  %v79_v3 = vld [vmem:[#allocation4 + $0x140] sm:$0xff]  ;;  %s515_s7 = scalar_lea.vmem %s3264_s1, %s514_s29  ;;  %s713_s10 = sand.u32 7, %s1932_s8 }
  0x31   :  { %2058 = vmatprep.subr.bf16.mxu1 %v2780_v44  ;;  %v86_v62 = vld [vmem:[#allocation4 + $0x178] sm:$0xff]  ;;  %v2801_v2 = vpack.c.bf16 %v84_v60, %v80_v59  ;;  %v83_v5 = vld [vmem:[#allocation4 + $0x160] sm:$0xff]  ;;  %v81_v6 = vld [vmem:[#allocation4 + $0x150] sm:$0xff]  ;;  %v263_v54 = vunpack.c.0.s8 %v262_v49  ;;  %v2878_v55 = vshrl.u32 %v264_v50, 7  ;;  %s1956_s2 = sshll.u32 %s710_s9, 5  ;;  %s912_s16 = sshra.s32 %s1936_s15, 3 }
  0x32   :  { %v2804_v7 = vpack.c.bf16 %v86_v62, %v82_v61  ;;  %v85_v10 = vld [vmem:[#allocation4 + $0x170] sm:$0xff]  ;;  %v88_v11 = vld [vmem:[#allocation4 + $0x188] sm:$0xff]  ;;  %v90_v14 = vld [vmem:[#allocation4 + $0x198] sm:$0xff]  ;;  %v2807_v16 = vpack.c.bf16 %v83_v5, %v79_v3  ;;  %s716_s11 = sadd.s32 %s1956_s2, %s713_s10  ;;  %s1957_s18 = sshll.u32 %s912_s16, 5 }
  0x33   :  { %2028 = vmatpush1.bf16.msra.mxu0 %v2783_v51  ;;  %v92_v12 = vld [vmem:[#allocation4 + $0x1a8] sm:$0xff]  ;;  %v94_v15 = vld [vmem:[#allocation4 + $0x1b8] sm:$0xff]  ;;  %v2811_v19 = vpack.c.bf16 %v85_v10, %v81_v6  ;;  %v87_v21 = vld [vmem:[#allocation4 + $0x180] sm:$0xff]  ;;  %v2881_v58 = vsub.s32 %v263_v54, %v2878_v55  ;;  %s717_s14 = scalar_lea.vmem %s3264_s1, %s716_s11  ;;  %s1114_s24 = sshra.s32 %s1940_s23, 3 }
  0x34   :  { %2060 = vmatpush1.bf16.msra.mxu1 %v2787_v52  ;;  %2030 = vmatprep.subr.bf16.mxu0 %v2789_v53  ;;  %v2813_v20 = vpack.c.bf16 %v92_v12, %v88_v11  ;;  %v91_v23 = vld [vmem:[#allocation4 + $0x1a0] sm:$0xff]  ;;  %v89_v24 = vld [vmem:[#allocation4 + $0x190] sm:$0xff]  ;;  %v2816_v25 = vpack.c.bf16 %v94_v15, %v90_v14  ;;  %v96_v29 = vld [vmem:[#allocation4 + $0x1c8] sm:$0xff]  ;;  %s1958_s0 = sshll.u32 %s1114_s24, 5  ;;  %s1316_s6 = sshra.s32 %s1944_s30, 3 }
  0x35   :  { %2062 = vmatprep.subr.bf16.mxu1 %v2792_v57  ;;  %v93_v28 = vld [vmem:[#allocation4 + $0x1b0] sm:$0xff]  ;;  %v100_v30 = vld [vmem:[#allocation4 + $0x1e8] sm:$0xff]  ;;  %v98_v32 = vld [vmem:[#allocation4 + $0x1d8] sm:$0xff]  ;;  %v2819_v34 = vpack.c.bf16 %v91_v23, %v87_v21  ;;  %s1959_s8 = sshll.u32 %s1316_s6, 5 }
  0x36   :  { %v102_v33 = vld [vmem:[#allocation4 + $0x1f8] sm:$0xff]  ;;  %v2823_v36 = vpack.c.bf16 %v93_v28, %v89_v24  ;;  %v2825_v37 = vpack.c.bf16 %v100_v30, %v96_v29  ;;  %v95_v38 = vld [vmem:[#allocation4 + $0x1c0] sm:$0xff]  ;;  %v97_v43 = vld [vmem:[#allocation4 + $0x1d0] sm:$0xff] }
  0x37   :  { %2032 = vmatpush1.bf16.msra.mxu0 %v2795_v63  ;;  %v99_v41 = vld [vmem:[#allocation4 + $0x1e0] sm:$0xff]  ;;  %v2828_v42 = vpack.c.bf16 %v102_v33, %v98_v32  ;;  %v101_v45 = vld [vmem:[#allocation4 + $0x1f0] sm:$0xff] }
  0x38   :  { %2064 = vmatpush1.bf16.msra.mxu1 %v2799_v1  ;;  %2034 = vmatprep.subr.bf16.mxu0 %v2801_v2  ;;  %v2831_v46 = vpack.c.bf16 %v99_v41, %v95_v38  ;;  %v2835_v47 = vpack.c.bf16 %v101_v45, %v97_v43  ;;  %v112_v11 = vld [vmem:[%s111_s17] ss:$8 sm:$0xf]  ;;  %s915_s17 = sand.u32 7, %s1936_s15 }
  0x39   :  { %2066 = vmatprep.subr.bf16.mxu1 %v2804_v7  ;;  %s918_s19 = sadd.s32 %s1957_s18, %s915_s17  ;;  %s1948_s17 = sld [smem:[#allocation3 + $0x7]] }
  0x3a   :  { %s919_s22 = scalar_lea.vmem %s3264_s1, %s918_s19 }
  0x3b   :  { %2036 = vmatpush1.bf16.msra.mxu0 %v2807_v16 }
  0x3c   :  { %2068 = vmatpush1.bf16.msra.mxu1 %v2811_v19  ;;  %2038 = vmatprep.subr.bf16.mxu0 %v2813_v20 }
  0x3d   :  { %2070 = vmatprep.subr.bf16.mxu1 %v2816_v25 }
  0x3f   :  { %2040 = vmatpush1.bf16.msra.mxu0 %v2819_v34  ;;  %s1518_s18 = sshra.s32 %s1948_s17, 3  ;;  %s1521_s19 = sand.u32 7, %s1948_s17 }
  0x40   :  { %2072 = vmatpush1.bf16.msra.mxu1 %v2823_v36  ;;  %2042 = vmatprep.subr.bf16.mxu0 %v2825_v37  ;;  %s1960_s20 = sshll.u32 %s1518_s18, 5 }
  0x41   :  { %2074 = vmatprep.subr.bf16.mxu1 %v2828_v42  ;;  %s1524_s21 = sadd.s32 %s1960_s20, %s1521_s19 }
  0x43   :  { %2044 = vmatpush1.bf16.msra.mxu0 %v2831_v46 }
  0x44   :  { %2076 = vmatpush1.bf16.msra.mxu1 %v2835_v47  ;;  %2078 = vmatprep.subr.bf16.mxu0 %v2744_v4 }
  0x45   :  { %2110 = vmatprep.subr.bf16.mxu1 %v2746_v8 }
  0x46   :  { %178 = vmatmul.mubr.f32.vlgmr.msra.gmra.mrb[0].mxu0 %v2692_v0 }
  0x47   :  { %249 = vmatmul.mubr.f32.vlgmr.msra.gmra.mrb[0].mxu1 %v2692_v0  ;;  %2080 = vmatpush1.bf16.msra.mxu0 %v2748_v9 }
  0x48   :  { %2112 = vmatpush1.bf16.msra.mxu1 %v2751_v13  ;;  %2082 = vmatprep.subr.bf16.mxu0 %v2755_v17 }
  0x49   :  { %2114 = vmatprep.subr.bf16.mxu1 %v2757_v18  ;;  %379 = vmatprep.mubr.f32.mxu0 %v2692_v0 }
  0x4a   :  { %450 = vmatprep.mubr.f32.mxu1 %v2692_v0 }
  0x4b   :  { %2084 = vmatpush1.bf16.msra.mxu0 %v2760_v22 }
  0x4c   :  { %2116 = vmatpush1.bf16.msra.mxu1 %v2764_v26  ;;  %2086 = vmatprep.subr.bf16.mxu0 %v2766_v27 }
  0x4d   :  { %2118 = vmatprep.subr.bf16.mxu1 %v2768_v31 }
  0x4f   :  { %2088 = vmatpush1.bf16.msra.mxu0 %v2771_v35 }
  0x50   :  { %2120 = vmatpush1.bf16.msra.mxu1 %v2775_v39  ;;  %2090 = vmatprep.subr.bf16.mxu0 %v2777_v40 }
  0x51   :  { %2122 = vmatprep.subr.bf16.mxu1 %v2780_v44 }
  0x53   :  { %2092 = vmatpush1.bf16.msra.mxu0 %v2783_v51 }
  0x54   :  { %2124 = vmatpush1.bf16.msra.mxu1 %v2787_v52  ;;  %2094 = vmatprep.subr.bf16.mxu0 %v2789_v53 }
  0x55   :  { %2126 = vmatprep.subr.bf16.mxu1 %v2792_v57 }
  0x57   :  { %2096 = vmatpush1.bf16.msra.mxu0 %v2795_v63 }
  0x58   :  { %2128 = vmatpush1.bf16.msra.mxu1 %v2799_v1  ;;  %2098 = vmatprep.subr.bf16.mxu0 %v2801_v2 }
  0x59   :  { %2130 = vmatprep.subr.bf16.mxu1 %v2804_v7 }
  0x5b   :  { %2100 = vmatpush1.bf16.msra.mxu0 %v2807_v16 }
  0x5c   :  { %2132 = vmatpush1.bf16.msra.mxu1 %v2811_v19  ;;  %2102 = vmatprep.subr.bf16.mxu0 %v2813_v20 }
  0x5d   :  { %2134 = vmatprep.subr.bf16.mxu1 %v2816_v25 }
  0x5f   :  { %2104 = vmatpush1.bf16.msra.mxu0 %v2819_v34 }
  0x60   :  { %2136 = vmatpush1.bf16.msra.mxu1 %v2823_v36  ;;  %2106 = vmatprep.subr.bf16.mxu0 %v2825_v37 }
  0x61   :  { %2138 = vmatprep.subr.bf16.mxu1 %v2828_v42 }
  0x63   :  { %2108 = vmatpush1.bf16.msra.mxu0 %v2831_v46 }
  0x64   :  { %2140 = vmatpush1.bf16.msra.mxu1 %v2835_v47  ;;  %2142 = vmatprep.subr.bf16.mxu0 %v2744_v4 }
  0x65   :  { %2174 = vmatprep.subr.bf16.mxu1 %v2746_v8 }
 0x119   :  { %v179_v56 = vpop.f32.mrb[0].mxu0 }
 0x11a   :  { %v250_v59 = vpop.f32.mrb[0].mxu1  ;;  %v181_v60 = vpop.f32.mrb[1].mxu0 }
 0x11b   :  { %v259_v61 = vcombine.low %v179_v56, %v181_v60  ;;  %v252_v62 = vpop.f32.mrb[1].mxu1 }
 0x11c   :  { %v260_v3 = vcombine.low %v250_v59, %v252_v62 }
 0x11d   :  { %v267_v5 = vrot.slane %v259_v61, %v2881_v58 }
 0x11e   :  { %v274_v6 = vrot.slane %v260_v3, %v2881_v58  ;;  %v314_v3 = vld [vmem:[%s313_s25] ss:$8 sm:$0xf]  ;;  %s1117_s25 = sand.u32 7, %s1940_s23 }
 0x11f   :  { %s1120_s26 = sadd.s32 %s1958_s0, %s1117_s25  ;;  %s2696_s25 = smov [#allocation7]  }
 0x120   :  { %v275_v10 = vcombine.low %v267_v5, %v274_v6  ;;  %s1121_s29 = scalar_lea.vmem %s3264_s1, %s1120_s26 }
 0x122   :  { %v282_v12 = vrot.slane %v275_v10, %v2881_v58 }
 0x124   :  { %v284_v14 = vadd.f32 %v282_v12, %v112_v11 }
 0x126   :  { %v1923_v15 = vmul.f32 -1.442695, %v284_v14 }
 0x128   :  { %2558 = vpow2.f32 %v1923_v15 }
 0x129   :  { %2560 = vtanh.f32 %v284_v14 }
 0x132   :  { %v2559_v21 = vpop.eup %2558 }
 0x133   :  { %v288_v23 = vadd.f32 1.0, %v2559_v21  ;;  %v2561_v24 = vpop.eup %2560 }
 0x134   :  { %v297_v30 = vrot.slane %v2561_v24, 2 }
 0x135   :  { %2562 = vrcp.f32 %v288_v23 }
 0x13f   :  { %v2563_v28 = vpop.eup %2562 }
 0x140   :  { %v293_v29 = vrot.slane %v2563_v28, 1  ;;  %v299_v33 = vmul.f32 %v2563_v28, %v297_v30  ;;  %v302_v41 = vrot.slane %v2563_v28, 3 }
 0x142   :  { %v295_v32 = vmul.f32 0.0, %v293_v29 }
 0x144   :  { %v2889_v38 = vadd.f32 %v299_v33, %v295_v32 }
 0x146   :  { %2564 = vtanh.f32 %v2889_v38 }
 0x150   :  { %v2565_v43 = vpop.eup %2564 }
 0x151   :  { %v2892_v45 = vmul.f32 %v2565_v43, %v302_v41 }
 0x153   :  { %380 = vmatmul.mubr.f32.vlgmr.msra.gmra.mrb[2].mxu0 %v2892_v45  ;;  %451 = vmatmul.mubr.f32.vlgmr.msra.gmra.mrb[2].mxu1 %v2892_v45 }
 0x154   :  { %2144 = vmatpush1.bf16.msra.mxu0 %v2748_v9  ;;  %2176 = vmatpush1.bf16.msra.mxu1 %v2751_v13 }
 0x155   :  { %2146 = vmatprep.subr.bf16.mxu0 %v2755_v17  ;;  %2178 = vmatprep.subr.bf16.mxu1 %v2757_v18 }
 0x156   :  { %581 = vmatprep.mubr.f32.mxu0 %v2692_v0  ;;  %652 = vmatprep.mubr.f32.mxu1 %v2692_v0 }
 0x158   :  { %2148 = vmatpush1.bf16.msra.mxu0 %v2760_v22  ;;  %2180 = vmatpush1.bf16.msra.mxu1 %v2764_v26 }
 0x159   :  { %2150 = vmatprep.subr.bf16.mxu0 %v2766_v27  ;;  %2182 = vmatprep.subr.bf16.mxu1 %v2768_v31 }
 0x15c   :  { %2152 = vmatpush1.bf16.msra.mxu0 %v2771_v35  ;;  %2184 = vmatpush1.bf16.msra.mxu1 %v2775_v39 }
 0x15d   :  { %2154 = vmatprep.subr.bf16.mxu0 %v2777_v40  ;;  %2186 = vmatprep.subr.bf16.mxu1 %v2780_v44 }
 0x160   :  { %2156 = vmatpush1.bf16.msra.mxu0 %v2783_v51  ;;  %2188 = vmatpush1.bf16.msra.mxu1 %v2787_v52 }
 0x161   :  { %2158 = vmatprep.subr.bf16.mxu0 %v2789_v53  ;;  %2190 = vmatprep.subr.bf16.mxu1 %v2792_v57 }
 0x164   :  { %2160 = vmatpush1.bf16.msra.mxu0 %v2795_v63  ;;  %2192 = vmatpush1.bf16.msra.mxu1 %v2799_v1 }
 0x165   :  { %2162 = vmatprep.subr.bf16.mxu0 %v2801_v2  ;;  %2194 = vmatprep.subr.bf16.mxu1 %v2804_v7 }
 0x168   :  { %2164 = vmatpush1.bf16.msra.mxu0 %v2807_v16  ;;  %2196 = vmatpush1.bf16.msra.mxu1 %v2811_v19 }
 0x169   :  { %2166 = vmatprep.subr.bf16.mxu0 %v2813_v20  ;;  %2198 = vmatprep.subr.bf16.mxu1 %v2816_v25 }
 0x16c   :  { %2168 = vmatpush1.bf16.msra.mxu0 %v2819_v34  ;;  %2200 = vmatpush1.bf16.msra.mxu1 %v2823_v36 }
 0x16d   :  { %2170 = vmatprep.subr.bf16.mxu0 %v2825_v37  ;;  %2202 = vmatprep.subr.bf16.mxu1 %v2828_v42 }
 0x170   :  { %2172 = vmatpush1.bf16.msra.mxu0 %v2831_v46  ;;  %2204 = vmatpush1.bf16.msra.mxu1 %v2835_v47 }
 0x171   :  { %2206 = vmatprep.subr.bf16.mxu0 %v2744_v4  ;;  %2238 = vmatprep.subr.bf16.mxu1 %v2746_v8 }
 0x226   :  { %v381_v48 = vpop.f32.mrb[2].mxu0  ;;  %v452_v49 = vpop.f32.mrb[2].mxu1 }
 0x227   :  { %v383_v50 = vpop.f32.mrb[3].mxu0  ;;  %v454_v54 = vpop.f32.mrb[3].mxu1 }
 0x228   :  { %v461_v56 = vcombine.low %v381_v48, %v383_v50  ;;  %v462_v59 = vcombine.low %v452_v49, %v454_v54 }
 0x22a   :  { %v469_v60 = vrot.slane %v461_v56, %v2881_v58  ;;  %v476_v61 = vrot.slane %v462_v59, %v2881_v58 }
 0x22c   :  { %v477_v62 = vcombine.low %v469_v60, %v476_v61  ;;  %v516_v60 = vld [vmem:[%s515_s7] ss:$8 sm:$0xf]  ;;  %s1319_s7 = sand.u32 7, %s1944_s30 }
 0x22d   :  { %s1322_s9 = sadd.s32 %s1959_s8, %s1319_s7 }
 0x22e   :  { %v484_v5 = vrot.slane %v477_v62, %v2881_v58  ;;  %s1323_s11 = scalar_lea.vmem %s3264_s1, %s1322_s9 }
 0x230   :  { %v486_v6 = vadd.f32 %v484_v5, %v314_v3 }
 0x232   :  { %v1927_v10 = vmul.f32 -1.442695, %v486_v6 }
 0x234   :  { %2566 = vpow2.f32 %v1927_v10 }
 0x235   :  { %2568 = vtanh.f32 %v486_v6 }
 0x23e   :  { %v2567_v11 = vpop.eup %2566 }
 0x23f   :  { %v490_v12 = vadd.f32 1.0, %v2567_v11  ;;  %v2569_v14 = vpop.eup %2568 }
 0x240   :  { %v499_v23 = vrot.slane %v2569_v14, 2 }
 0x241   :  { %2570 = vrcp.f32 %v490_v12 }
 0x24b   :  { %v2571_v15 = vpop.eup %2570 }
 0x24c   :  { %v495_v21 = vrot.slane %v2571_v15, 1  ;;  %v501_v28 = vmul.f32 %v2571_v15, %v499_v23  ;;  %v504_v30 = vrot.slane %v2571_v15, 3 }
 0x24e   :  { %v497_v24 = vmul.f32 %v495_v21, %v2889_v38 }
 0x250   :  { %v2937_v29 = vadd.f32 %v501_v28, %v497_v24  ;;  %v2989_v24 = vsub.s32 0, %v2878_v55 }
 0x252   :  { %2572 = vtanh.f32 %v2937_v29 }
 0x25c   :  { %v2573_v32 = vpop.eup %2572 }
 0x25d   :  { %v2940_v33 = vmul.f32 %v2573_v32, %v504_v30 }
 0x25f   :  { %582 = vmatmul.mubr.f32.vlgmr.msra.gmra.mrb[4].mxu0 %v2940_v33  ;;  %653 = vmatmul.mubr.f32.vlgmr.msra.gmra.mrb[4].mxu1 %v2940_v33  ;;  %v1723_v32 = vrot.slane %v2940_v33, %v2989_v24 }
 0x260   :  { %2208 = vmatpush1.bf16.msra.mxu0 %v2748_v9  ;;  %2240 = vmatpush1.bf16.msra.mxu1 %v2751_v13 }
 0x261   :  { %2210 = vmatprep.subr.bf16.mxu0 %v2755_v17  ;;  %2242 = vmatprep.subr.bf16.mxu1 %v2757_v18 }
 0x262   :  { %783 = vmatprep.mubr.f32.mxu0 %v2692_v0  ;;  %854 = vmatprep.mubr.f32.mxu1 %v2692_v0 }
 0x264   :  { %2212 = vmatpush1.bf16.msra.mxu0 %v2760_v22  ;;  %2244 = vmatpush1.bf16.msra.mxu1 %v2764_v26 }
 0x265   :  { %2214 = vmatprep.subr.bf16.mxu0 %v2766_v27  ;;  %2246 = vmatprep.subr.bf16.mxu1 %v2768_v31 }
 0x268   :  { %2216 = vmatpush1.bf16.msra.mxu0 %v2771_v35  ;;  %2248 = vmatpush1.bf16.msra.mxu1 %v2775_v39 }
 0x269   :  { %2218 = vmatprep.subr.bf16.mxu0 %v2777_v40  ;;  %2250 = vmatprep.subr.bf16.mxu1 %v2780_v44 }
 0x26c   :  { %2220 = vmatpush1.bf16.msra.mxu0 %v2783_v51  ;;  %2252 = vmatpush1.bf16.msra.mxu1 %v2787_v52 }
 0x26d   :  { %2222 = vmatprep.subr.bf16.mxu0 %v2789_v53  ;;  %2254 = vmatprep.subr.bf16.mxu1 %v2792_v57 }
 0x270   :  { %2224 = vmatpush1.bf16.msra.mxu0 %v2795_v63  ;;  %2256 = vmatpush1.bf16.msra.mxu1 %v2799_v1 }
 0x271   :  { %2226 = vmatprep.subr.bf16.mxu0 %v2801_v2  ;;  %2258 = vmatprep.subr.bf16.mxu1 %v2804_v7 }
 0x274   :  { %2228 = vmatpush1.bf16.msra.mxu0 %v2807_v16  ;;  %2260 = vmatpush1.bf16.msra.mxu1 %v2811_v19 }
 0x275   :  { %2230 = vmatprep.subr.bf16.mxu0 %v2813_v20  ;;  %2262 = vmatprep.subr.bf16.mxu1 %v2816_v25 }
 0x278   :  { %2232 = vmatpush1.bf16.msra.mxu0 %v2819_v34  ;;  %2264 = vmatpush1.bf16.msra.mxu1 %v2823_v36 }
 0x279   :  { %2234 = vmatprep.subr.bf16.mxu0 %v2825_v37  ;;  %2266 = vmatprep.subr.bf16.mxu1 %v2828_v42 }
 0x27c   :  { %2236 = vmatpush1.bf16.msra.mxu0 %v2831_v46  ;;  %2268 = vmatpush1.bf16.msra.mxu1 %v2835_v47 }
 0x27d   :  { %2270 = vmatprep.subr.bf16.mxu0 %v2744_v4  ;;  %2302 = vmatprep.subr.bf16.mxu1 %v2746_v8 }
 0x332   :  { %v583_v38 = vpop.f32.mrb[4].mxu0  ;;  %v654_v41 = vpop.f32.mrb[4].mxu1 }
 0x333   :  { %v585_v43 = vpop.f32.mrb[5].mxu0  ;;  %v656_v48 = vpop.f32.mrb[5].mxu1 }
 0x334   :  { %v663_v49 = vcombine.low %v583_v38, %v585_v43  ;;  %v664_v50 = vcombine.low %v654_v41, %v656_v48 }
 0x336   :  { %v671_v54 = vrot.slane %v663_v49, %v2881_v58  ;;  %v678_v56 = vrot.slane %v664_v50, %v2881_v58 }
 0x338   :  { %v679_v59 = vcombine.low %v671_v54, %v678_v56 }
 0x33a   :  { %v686_v61 = vrot.slane %v679_v59, %v2881_v58 }
 0x33c   :  { %v688_v62 = vadd.f32 %v686_v61, %v516_v60  ;;  %v718_v60 = vld [vmem:[%s717_s14] ss:$8 sm:$0xf] }
 0x33e   :  { %v1931_v3 = vmul.f32 -1.442695, %v688_v62 }
 0x340   :  { %2574 = vpow2.f32 %v1931_v3 }
 0x341   :  { %2576 = vtanh.f32 %v688_v62 }
 0x34a   :  { %v2575_v5 = vpop.eup %2574 }
 0x34b   :  { %v692_v6 = vadd.f32 1.0, %v2575_v5  ;;  %v2577_v10 = vpop.eup %2576 }
 0x34c   :  { %v701_v14 = vrot.slane %v2577_v10, 2 }
 0x34d   :  { %2578 = vrcp.f32 %v692_v6 }
 0x357   :  { %v2579_v11 = vpop.eup %2578 }
 0x358   :  { %v697_v12 = vrot.slane %v2579_v11, 1  ;;  %v703_v21 = vmul.f32 %v2579_v11, %v701_v14  ;;  %v706_v28 = vrot.slane %v2579_v11, 3 }
 0x35a   :  { %v699_v15 = vmul.f32 %v697_v12, %v2937_v29  ;;  %v1762_v29 = vsel %vm1761_vm0, %v2892_v45, %v1723_v32 }
 0x35c   :  { %v2985_v23 = vadd.f32 %v703_v21, %v699_v15 }
 0x35e   :  { %2580 = vtanh.f32 %v2985_v23 }
 0x368   :  { %v2581_v30 = vpop.eup %2580 }
 0x369   :  { %v708_v38 = vmul.f32 %v2581_v30, %v706_v28 }
 0x36b   :  { %784 = vmatmul.mubr.f32.vlgmr.msra.gmra.mrb[6].mxu0 %v708_v38  ;;  %v1729_v41 = vrot.slane %v708_v38, %v2989_v24  ;;  %855 = vmatmul.mubr.f32.vlgmr.msra.gmra.mrb[6].mxu1 %v708_v38 }
 0x36c   :  { %2272 = vmatpush1.bf16.msra.mxu0 %v2748_v9  ;;  %2304 = vmatpush1.bf16.msra.mxu1 %v2751_v13 }
 0x36d   :  { %2274 = vmatprep.subr.bf16.mxu0 %v2755_v17  ;;  %2306 = vmatprep.subr.bf16.mxu1 %v2757_v18  ;;  %v2999_v55 = vsel %vm1763_vm1, %v1762_v29, %v1729_v41 }
 0x36e   :  { %985 = vmatprep.mubr.f32.mxu0 %v2692_v0  ;;  %1056 = vmatprep.mubr.f32.mxu1 %v2692_v0 }
 0x370   :  { %2276 = vmatpush1.bf16.msra.mxu0 %v2760_v22  ;;  %2308 = vmatpush1.bf16.msra.mxu1 %v2764_v26 }
 0x371   :  { %2278 = vmatprep.subr.bf16.mxu0 %v2766_v27  ;;  %2310 = vmatprep.subr.bf16.mxu1 %v2768_v31 }
 0x374   :  { %2280 = vmatpush1.bf16.msra.mxu0 %v2771_v35  ;;  %2312 = vmatpush1.bf16.msra.mxu1 %v2775_v39 }
 0x375   :  { %2282 = vmatprep.subr.bf16.mxu0 %v2777_v40  ;;  %2314 = vmatprep.subr.bf16.mxu1 %v2780_v44 }
 0x378   :  { %2284 = vmatpush1.bf16.msra.mxu0 %v2783_v51  ;;  %2316 = vmatpush1.bf16.msra.mxu1 %v2787_v52 }
 0x379   :  { %2286 = vmatprep.subr.bf16.mxu0 %v2789_v53  ;;  %2318 = vmatprep.subr.bf16.mxu1 %v2792_v57 }
 0x37c   :  { %2288 = vmatpush1.bf16.msra.mxu0 %v2795_v63  ;;  %2320 = vmatpush1.bf16.msra.mxu1 %v2799_v1 }
 0x37d   :  { %2290 = vmatprep.subr.bf16.mxu0 %v2801_v2  ;;  %2322 = vmatprep.subr.bf16.mxu1 %v2804_v7 }
 0x380   :  { %2292 = vmatpush1.bf16.msra.mxu0 %v2807_v16  ;;  %2324 = vmatpush1.bf16.msra.mxu1 %v2811_v19 }
 0x381   :  { %2294 = vmatprep.subr.bf16.mxu0 %v2813_v20  ;;  %2326 = vmatprep.subr.bf16.mxu1 %v2816_v25 }
 0x384   :  { %2296 = vmatpush1.bf16.msra.mxu0 %v2819_v34  ;;  %2328 = vmatpush1.bf16.msra.mxu1 %v2823_v36 }
 0x385   :  { %2298 = vmatprep.subr.bf16.mxu0 %v2825_v37  ;;  %2330 = vmatprep.subr.bf16.mxu1 %v2828_v42 }
 0x388   :  { %2300 = vmatpush1.bf16.msra.mxu0 %v2831_v46  ;;  %2332 = vmatpush1.bf16.msra.mxu1 %v2835_v47 }
 0x389   :  { %2334 = vmatprep.subr.bf16.mxu0 %v2744_v4  ;;  %2366 = vmatprep.subr.bf16.mxu1 %v2746_v8 }
 0x43e   :  { %v785_v45 = vpop.f32.mrb[6].mxu0  ;;  %v856_v33 = vpop.f32.mrb[6].mxu1 }
 0x43f   :  { %v787_v43 = vpop.f32.mrb[7].mxu0  ;;  %v858_v48 = vpop.f32.mrb[7].mxu1 }
 0x440   :  { %v865_v49 = vcombine.low %v785_v45, %v787_v43  ;;  %v866_v50 = vcombine.low %v856_v33, %v858_v48 }
 0x442   :  { %v873_v54 = vrot.slane %v865_v49, %v2881_v58  ;;  %v880_v56 = vrot.slane %v866_v50, %v2881_v58 }
 0x444   :  { %v881_v59 = vcombine.low %v873_v54, %v880_v56  ;;  %v920_v56 = vld [vmem:[%s919_s22] ss:$8 sm:$0xf] }
 0x446   :  { %v888_v61 = vrot.slane %v881_v59, %v2881_v58 }
 0x448   :  { %v890_v62 = vadd.f32 %v888_v61, %v718_v60 }
 0x44a   :  { %v1935_v3 = vmul.f32 -1.442695, %v890_v62 }
 0x44c   :  { %2582 = vpow2.f32 %v1935_v3 }
 0x44d   :  { %2584 = vtanh.f32 %v890_v62 }
 0x456   :  { %v2583_v5 = vpop.eup %2582 }
 0x457   :  { %v894_v6 = vadd.f32 1.0, %v2583_v5  ;;  %v2585_v10 = vpop.eup %2584 }
 0x458   :  { %v903_v14 = vrot.slane %v2585_v10, 2 }
 0x459   :  { %2586 = vrcp.f32 %v894_v6 }
 0x463   :  { %v2587_v11 = vpop.eup %2586 }
 0x464   :  { %v899_v12 = vrot.slane %v2587_v11, 1  ;;  %v905_v21 = vmul.f32 %v2587_v11, %v903_v14  ;;  %v908_v30 = vrot.slane %v2587_v11, 3 }
 0x466   :  { %v901_v15 = vmul.f32 %v899_v12, %v2985_v23 }
 0x468   :  { %v3038_v28 = vadd.f32 %v905_v21, %v901_v15 }
 0x46a   :  { %2588 = vtanh.f32 %v3038_v28 }
 0x474   :  { %v2589_v32 = vpop.eup %2588 }
 0x475   :  { %v910_v38 = vmul.f32 %v2589_v32, %v908_v30 }
 0x477   :  { %986 = vmatmul.mubr.f32.vlgmr.msra.gmra.mrb[8].mxu0 %v910_v38  ;;  %v1735_v41 = vrot.slane %v910_v38, %v2989_v24  ;;  %1057 = vmatmul.mubr.f32.vlgmr.msra.gmra.mrb[8].mxu1 %v910_v38 }
 0x478   :  { %2336 = vmatpush1.bf16.msra.mxu0 %v2748_v9  ;;  %2368 = vmatpush1.bf16.msra.mxu1 %v2751_v13 }
 0x479   :  { %2338 = vmatprep.subr.bf16.mxu0 %v2755_v17  ;;  %2370 = vmatprep.subr.bf16.mxu1 %v2757_v18  ;;  %v3047_v23 = vsel %vm1765_vm2, %v2999_v55, %v1735_v41 }
 0x47a   :  { %1187 = vmatprep.mubr.f32.mxu0 %v2692_v0  ;;  %1258 = vmatprep.mubr.f32.mxu1 %v2692_v0 }
 0x47c   :  { %2340 = vmatpush1.bf16.msra.mxu0 %v2760_v22  ;;  %2372 = vmatpush1.bf16.msra.mxu1 %v2764_v26 }
 0x47d   :  { %2342 = vmatprep.subr.bf16.mxu0 %v2766_v27  ;;  %2374 = vmatprep.subr.bf16.mxu1 %v2768_v31 }
 0x480   :  { %2344 = vmatpush1.bf16.msra.mxu0 %v2771_v35  ;;  %2376 = vmatpush1.bf16.msra.mxu1 %v2775_v39 }
 0x481   :  { %2346 = vmatprep.subr.bf16.mxu0 %v2777_v40  ;;  %2378 = vmatprep.subr.bf16.mxu1 %v2780_v44 }
 0x484   :  { %2348 = vmatpush1.bf16.msra.mxu0 %v2783_v51  ;;  %2380 = vmatpush1.bf16.msra.mxu1 %v2787_v52 }
 0x485   :  { %2350 = vmatprep.subr.bf16.mxu0 %v2789_v53  ;;  %2382 = vmatprep.subr.bf16.mxu1 %v2792_v57 }
 0x488   :  { %2352 = vmatpush1.bf16.msra.mxu0 %v2795_v63  ;;  %2384 = vmatpush1.bf16.msra.mxu1 %v2799_v1 }
 0x489   :  { %2354 = vmatprep.subr.bf16.mxu0 %v2801_v2  ;;  %2386 = vmatprep.subr.bf16.mxu1 %v2804_v7 }
 0x48c   :  { %2356 = vmatpush1.bf16.msra.mxu0 %v2807_v16  ;;  %2388 = vmatpush1.bf16.msra.mxu1 %v2811_v19 }
 0x48d   :  { %2358 = vmatprep.subr.bf16.mxu0 %v2813_v20  ;;  %2390 = vmatprep.subr.bf16.mxu1 %v2816_v25 }
 0x490   :  { %2360 = vmatpush1.bf16.msra.mxu0 %v2819_v34  ;;  %2392 = vmatpush1.bf16.msra.mxu1 %v2823_v36 }
 0x491   :  { %2362 = vmatprep.subr.bf16.mxu0 %v2825_v37  ;;  %2394 = vmatprep.subr.bf16.mxu1 %v2828_v42 }
 0x494   :  { %2364 = vmatpush1.bf16.msra.mxu0 %v2831_v46  ;;  %2396 = vmatpush1.bf16.msra.mxu1 %v2835_v47 }
 0x495   :  { %2398 = vmatprep.subr.bf16.mxu0 %v2744_v4  ;;  %2430 = vmatprep.subr.bf16.mxu1 %v2746_v8 }
 0x54a   :  { %v987_v29 = vpop.f32.mrb[8].mxu0  ;;  %v1058_v55 = vpop.f32.mrb[8].mxu1 }
 0x54b   :  { %v989_v45 = vpop.f32.mrb[9].mxu0  ;;  %v1060_v33 = vpop.f32.mrb[9].mxu1 }
 0x54c   :  { %v1067_v43 = vcombine.low %v987_v29, %v989_v45  ;;  %v1068_v48 = vcombine.low %v1058_v55, %v1060_v33 }
 0x54e   :  { %v1075_v49 = vrot.slane %v1067_v43, %v2881_v58  ;;  %v1082_v50 = vrot.slane %v1068_v48, %v2881_v58  ;;  %v1122_v48 = vld [vmem:[%s1121_s29] ss:$8 sm:$0xf] }
 0x550   :  { %v1083_v54 = vcombine.low %v1075_v49, %v1082_v50 }
 0x552   :  { %v1090_v59 = vrot.slane %v1083_v54, %v2881_v58 }
 0x554   :  { %v1092_v60 = vadd.f32 %v1090_v59, %v920_v56 }
 0x556   :  { %v1939_v61 = vmul.f32 -1.442695, %v1092_v60 }
 0x558   :  { %2590 = vpow2.f32 %v1939_v61 }
 0x559   :  { %2592 = vtanh.f32 %v1092_v60 }
 0x562   :  { %v2591_v62 = vpop.eup %2590 }
 0x563   :  { %v1096_v3 = vadd.f32 1.0, %v2591_v62  ;;  %v2593_v5 = vpop.eup %2592 }
 0x564   :  { %v1105_v11 = vrot.slane %v2593_v5, 2 }
 0x565   :  { %2594 = vrcp.f32 %v1096_v3 }
 0x56f   :  { %v2595_v6 = vpop.eup %2594 }
 0x570   :  { %v1101_v10 = vrot.slane %v2595_v6, 1  ;;  %v1107_v14 = vmul.f32 %v2595_v6, %v1105_v11  ;;  %v1110_v21 = vrot.slane %v2595_v6, 3 }
 0x572   :  { %v1103_v12 = vmul.f32 %v1101_v10, %v3038_v28 }
 0x574   :  { %v3086_v15 = vadd.f32 %v1107_v14, %v1103_v12 }
 0x576   :  { %2596 = vtanh.f32 %v3086_v15 }
 0x580   :  { %v2597_v30 = vpop.eup %2596 }
 0x581   :  { %v1112_v32 = vmul.f32 %v2597_v30, %v1110_v21  ;;  %v2694_v30 = vmov 0.0|0.0  }
 0x583   :  { %1188 = vmatmul.mubr.f32.vlgmr.msra.gmra.mrb[10].mxu0 %v1112_v32  ;;  %v1741_v38 = vrot.slane %v1112_v32, %v2989_v24  ;;  %1259 = vmatmul.mubr.f32.vlgmr.msra.gmra.mrb[10].mxu1 %v1112_v32  ;;  %v1777_v32 = vld [vmem:[%s3266_s3 + $0x10] sm:$0xff] }
 0x584   :  { %2400 = vmatpush1.bf16.msra.mxu0 %v2748_v9  ;;  %2432 = vmatpush1.bf16.msra.mxu1 %v2751_v13 }
 0x585   :  { %2402 = vmatprep.subr.bf16.mxu0 %v2755_v17  ;;  %2434 = vmatprep.subr.bf16.mxu1 %v2757_v18  ;;  %v3095_v28 = vsel %vm1767_vm3, %v3047_v23, %v1741_v38  ;;  %v1778_v38 = vld [vmem:[%s3266_s3 + $0x18] sm:$0xff] }
 0x586   :  { %1389 = vmatprep.mubr.f32.mxu0 %v2692_v0  ;;  %1460 = vmatprep.mubr.f32.mxu1 %v2692_v0 }
 0x588   :  { %2404 = vmatpush1.bf16.msra.mxu0 %v2760_v22  ;;  %2436 = vmatpush1.bf16.msra.mxu1 %v2764_v26 }
 0x589   :  { %2406 = vmatprep.subr.bf16.mxu0 %v2766_v27  ;;  %2438 = vmatprep.subr.bf16.mxu1 %v2768_v31 }
 0x58c   :  { %2408 = vmatpush1.bf16.msra.mxu0 %v2771_v35  ;;  %2440 = vmatpush1.bf16.msra.mxu1 %v2775_v39 }
 0x58d   :  { %2410 = vmatprep.subr.bf16.mxu0 %v2777_v40  ;;  %2442 = vmatprep.subr.bf16.mxu1 %v2780_v44 }
 0x590   :  { %2412 = vmatpush1.bf16.msra.mxu0 %v2783_v51  ;;  %2444 = vmatpush1.bf16.msra.mxu1 %v2787_v52 }
 0x591   :  { %2414 = vmatprep.subr.bf16.mxu0 %v2789_v53  ;;  %2446 = vmatprep.subr.bf16.mxu1 %v2792_v57 }
 0x594   :  { %2416 = vmatpush1.bf16.msra.mxu0 %v2795_v63  ;;  %2448 = vmatpush1.bf16.msra.mxu1 %v2799_v1 }
 0x595   :  { %2418 = vmatprep.subr.bf16.mxu0 %v2801_v2  ;;  %2450 = vmatprep.subr.bf16.mxu1 %v2804_v7 }
 0x598   :  { %2420 = vmatpush1.bf16.msra.mxu0 %v2807_v16  ;;  %2452 = vmatpush1.bf16.msra.mxu1 %v2811_v19 }
 0x599   :  { %2422 = vmatprep.subr.bf16.mxu0 %v2813_v20  ;;  %2454 = vmatprep.subr.bf16.mxu1 %v2816_v25 }
 0x59c   :  { %2424 = vmatpush1.bf16.msra.mxu0 %v2819_v34  ;;  %2456 = vmatpush1.bf16.msra.mxu1 %v2823_v36 }
 0x59d   :  { %2426 = vmatprep.subr.bf16.mxu0 %v2825_v37  ;;  %2458 = vmatprep.subr.bf16.mxu1 %v2828_v42 }
 0x5a0   :  { %2428 = vmatpush1.bf16.msra.mxu0 %v2831_v46  ;;  %2460 = vmatpush1.bf16.msra.mxu1 %v2835_v47 }
 0x5a1   :  { %2462 = vmatprep.subr.bf16.mxu0 %v2744_v4  ;;  %2494 = vmatprep.subr.bf16.mxu1 %v2746_v8 }
 0x656   :  { %v1189_v41 = vpop.f32.mrb[10].mxu0  ;;  %v1260_v23 = vpop.f32.mrb[10].mxu1 }
 0x657   :  { %v1191_v29 = vpop.f32.mrb[11].mxu0  ;;  %v1262_v55 = vpop.f32.mrb[11].mxu1 }
 0x658   :  { %v1269_v45 = vcombine.low %v1189_v41, %v1191_v29  ;;  %v1270_v33 = vcombine.low %v1260_v23, %v1262_v55  ;;  %v1779_v41 = vld [vmem:[%s3266_s3 + $0x20] sm:$0xff]  ;;  %v1780_v23 = vld [vmem:[%s3266_s3 + $0x28] sm:$0xff]  ;;  %v1781_v55 = vld [vmem:[%s3266_s3 + $0x30] sm:$0xff] }
 0x659   :  { %v2532_v29 = vpack.c.bf16 %v1780_v23, %v1779_v41 }
 0x65a   :  { %v1277_v43 = vrot.slane %v1269_v45, %v2881_v58  ;;  %v1284_v4 = vrot.slane %v1270_v33, %v2881_v58  ;;  %v1782_v45 = vld [vmem:[%s3266_s3 + $0x38] sm:$0xff] }
 0x65b   :  { %v2535_v33 = vpack.c.bf16 %v1782_v45, %v1781_v55 }
 0x65c   :  { %v1285_v8 = vcombine.low %v1277_v43, %v1284_v4  ;;  %v1783_v43 = vld [vmem:[%s3266_s3 + $0x40] sm:$0xff]  ;;  %v1784_v4 = vld [vmem:[%s3266_s3 + $0x48] sm:$0xff] }
 0x65e   :  { %v1292_v49 = vrot.slane %v1285_v8, %v2881_v58  ;;  %v2538_v8 = vpack.c.bf16 %v1784_v4, %v1783_v43 }
 0x660   :  { %v1294_v50 = vadd.f32 %v1292_v49, %v1122_v48  ;;  %v1785_v48 = vld [vmem:[%s3266_s3 + $0x50] sm:$0xff]  ;;  %v1786_v49 = vld [vmem:[%s3266_s3 + $0x58] sm:$0xff] }
 0x662   :  { %v1943_v54 = vmul.f32 -1.442695, %v1294_v50 }
 0x664   :  { %2598 = vpow2.f32 %v1943_v54  ;;  %v1787_v54 = vld [vmem:[%s3266_s3 + $0x60] sm:$0xff] }
 0x665   :  { %2600 = vtanh.f32 %v1294_v50  ;;  %v2541_v50 = vpack.c.bf16 %v1786_v49, %v1785_v48 }
 0x66e   :  { %v2599_v56 = vpop.eup %2598 }
 0x66f   :  { %v1298_v59 = vadd.f32 1.0, %v2599_v56  ;;  %v2601_v60 = vpop.eup %2600  ;;  %v1788_v56 = vld [vmem:[%s3266_s3 + $0x68] sm:$0xff] }
 0x670   :  { %v1307_v3 = vrot.slane %v2601_v60, 2  ;;  %v1789_v60 = vld [vmem:[%s3266_s3 + $0x70] sm:$0xff] }
 0x671   :  { %2602 = vrcp.f32 %v1298_v59  ;;  %v2544_v59 = vpack.c.bf16 %v1788_v56, %v1787_v54 }
 0x67b   :  { %v2603_v61 = vpop.eup %2602 }
 0x67c   :  { %v1303_v62 = vrot.slane %v2603_v61, 1  ;;  %v1309_v6 = vmul.f32 %v2603_v61, %v1307_v3  ;;  %v1312_v11 = vrot.slane %v2603_v61, 3 }
 0x67e   :  { %v1305_v5 = vmul.f32 %v1303_v62, %v3086_v15 }
 0x680   :  { %v3134_v10 = vadd.f32 %v1309_v6, %v1305_v5 }
 0x682   :  { %2604 = vtanh.f32 %v3134_v10 }
 0x68c   :  { %v2605_v12 = vpop.eup %2604 }
 0x68d   :  { %v1314_v14 = vmul.f32 %v2605_v12, %v1312_v11 }
 0x68f   :  { %1390 = vmatmul.mubr.f32.vlgmr.msra.gmra.mrb[12].mxu0 %v1314_v14  ;;  %v1747_v21 = vrot.slane %v1314_v14, %v2989_v24  ;;  %1461 = vmatmul.mubr.f32.vlgmr.msra.gmra.mrb[12].mxu1 %v1314_v14 }
 0x690   :  { %2464 = vmatpush1.bf16.msra.mxu0 %v2748_v9  ;;  %2496 = vmatpush1.bf16.msra.mxu1 %v2751_v13 }
 0x691   :  { %2466 = vmatprep.subr.bf16.mxu0 %v2755_v17  ;;  %2498 = vmatprep.subr.bf16.mxu1 %v2757_v18  ;;  %v3143_v15 = vsel %vm1769_vm4, %v3095_v28, %v1747_v21  ;;  %v2529_v28 = vpack.c.bf16 %v1778_v38, %v1777_v32 }
 0x692   :  { %1591 = vmatprep.mubr.f32.mxu0 %v2692_v0  ;;  %1662 = vmatprep.mubr.f32.mxu1 %v2692_v0 }
 0x694   :  { %2468 = vmatpush1.bf16.msra.mxu0 %v2760_v22  ;;  %2500 = vmatpush1.bf16.msra.mxu1 %v2764_v26 }
 0x695   :  { %2470 = vmatprep.subr.bf16.mxu0 %v2766_v27  ;;  %2502 = vmatprep.subr.bf16.mxu1 %v2768_v31 }
 0x698   :  { %2472 = vmatpush1.bf16.msra.mxu0 %v2771_v35  ;;  %2504 = vmatpush1.bf16.msra.mxu1 %v2775_v39  ;;  %v1324_v39 = vld [vmem:[%s1323_s11] ss:$8 sm:$0xf] }
 0x699   :  { %2474 = vmatprep.subr.bf16.mxu0 %v2777_v40  ;;  %2506 = vmatprep.subr.bf16.mxu1 %v2780_v44 }
 0x69c   :  { %2476 = vmatpush1.bf16.msra.mxu0 %v2783_v51  ;;  %2508 = vmatpush1.bf16.msra.mxu1 %v2787_v52 }
 0x69d   :  { %2478 = vmatprep.subr.bf16.mxu0 %v2789_v53  ;;  %2510 = vmatprep.subr.bf16.mxu1 %v2792_v57 }
 0x6a0   :  { %2480 = vmatpush1.bf16.msra.mxu0 %v2795_v63  ;;  %2512 = vmatpush1.bf16.msra.mxu1 %v2799_v1 }
 0x6a1   :  { %2482 = vmatprep.subr.bf16.mxu0 %v2801_v2  ;;  %2514 = vmatprep.subr.bf16.mxu1 %v2804_v7 }
 0x6a4   :  { %2484 = vmatpush1.bf16.msra.mxu0 %v2807_v16  ;;  %2516 = vmatpush1.bf16.msra.mxu1 %v2811_v19 }
 0x6a5   :  { %2486 = vmatprep.subr.bf16.mxu0 %v2813_v20  ;;  %2518 = vmatprep.subr.bf16.mxu1 %v2816_v25 }
 0x6a8   :  { %2488 = vmatpush1.bf16.msra.mxu0 %v2819_v34  ;;  %2520 = vmatpush1.bf16.msra.mxu1 %v2823_v36 }
 0x6a9   :  { %2490 = vmatprep.subr.bf16.mxu0 %v2825_v37  ;;  %2522 = vmatprep.subr.bf16.mxu1 %v2828_v42  ;;  %v1775_v42 = vld [vmem:[%s3266_s3] sm:$0xff] }
 0x6ac   :  { %2492 = vmatpush1.bf16.msra.mxu0 %v2831_v46  ;;  %2524 = vmatpush1.bf16.msra.mxu1 %v2835_v47  ;;  %v1776_v46 = vld [vmem:[%s3266_s3 + $0x8] sm:$0xff] }
 0x6ad   :  { %v2526_v47 = vpack.c.bf16 %v1776_v46, %v1775_v42  ;;  %2525 = vmatprep.subr.bf16.mxu0 %v2694_v30 }
 0x762   :  { %v1391_v9 = vpop.f32.mrb[12].mxu0  ;;  %v1462_v13 = vpop.f32.mrb[12].mxu1 }
 0x763   :  { %v1393_v17 = vpop.f32.mrb[13].mxu0  ;;  %v1464_v18 = vpop.f32.mrb[13].mxu1 }
 0x764   :  { %v1471_v22 = vcombine.low %v1391_v9, %v1393_v17  ;;  %v1472_v26 = vcombine.low %v1462_v13, %v1464_v18 }
 0x766   :  { %v1479_v27 = vrot.slane %v1471_v22, %v2881_v58  ;;  %v1486_v31 = vrot.slane %v1472_v26, %v2881_v58 }
 0x768   :  { %v1487_v35 = vcombine.low %v1479_v27, %v1486_v31 }
 0x76a   :  { %v1494_v40 = vrot.slane %v1487_v35, %v2881_v58 }
 0x76c   :  { %v1496_v44 = vadd.f32 %v1494_v40, %v1324_v39 }
 0x76e   :  { %v1947_v51 = vmul.f32 -1.442695, %v1496_v44 }
 0x770   :  { %2606 = vpow2.f32 %v1947_v51 }
 0x771   :  { %2608 = vtanh.f32 %v1496_v44 }
 0x77a   :  { %v2607_v52 = vpop.eup %2606 }
 0x77b   :  { %v1500_v53 = vadd.f32 1.0, %v2607_v52  ;;  %v2609_v57 = vpop.eup %2608 }
 0x77c   :  { %v1509_v2 = vrot.slane %v2609_v57, 2 }
 0x77d   :  { %2610 = vrcp.f32 %v1500_v53 }
 0x787   :  { %v2611_v63 = vpop.eup %2610 }
 0x788   :  { %v1505_v1 = vrot.slane %v2611_v63, 1  ;;  %v1511_v16 = vmul.f32 %v2611_v63, %v1509_v2  ;;  %v1514_v20 = vrot.slane %v2611_v63, 3  ;;  %v1952_v63 = vld [vmem:[%s3267_s4] ss:$0 sm:$0xff]  ;;  %s1888_s4 = sshll.u32 %s2696_s25, 4  ;;  %s1889_s4 = int_to_ptr.vmem [resolvable:$true] %s1888_s4 }
 0x789   :  { %s2660_s0 = scalar_lea.vmem %s1889_s4, 128  ;;  %p2665_p0 = scmp.lt.s32.totalorder %s1889_s4, %s1889_s4 }
 0x78a   :  { %v1507_v7 = vmul.f32 %v1505_v1, %v3134_v10  ;;  %p2661_p13 = scmp.ne.s32.totalorder %s1889_s4, %s2660_s0  ;;  %p2666_p1 = scmp.lt.s32.totalorder %s2660_s0, %s2660_s0 }
 0x78c   :  { %v3180_v19 = vadd.f32 %v1511_v16, %v1507_v7  ;;  %p2667_p2 = por %p2666_p1, %p2665_p0 }
 0x78e   :  { %2612 = vtanh.f32 %v3180_v19  ;;  %p2668_p3 = pnand %p2667_p2, %p2661_p13 }
 0x798   :  { %v2613_v25 = vpop.eup %2612 }
 0x799   :  { %v1516_v34 = vmul.f32 %v2613_v25, %v1514_v20 }
 0x79b   :  { %1592 = vmatmul.mubr.f32.vlgmr.msra.gmra.mrb[14].mxu0 %v1516_v34  ;;  %1663 = vmatmul.mubr.f32.vlgmr.msra.gmra.mrb[14].mxu1 %v1516_v34  ;;  %v1753_v36 = vrot.slane %v1516_v34, %v2989_v24 }
 0x79c   :  { %2527 = vmatpush3.bf16.msra.mxu0 %v2526_v47  ;;  %2010 = vmatprep.mubr.msk.f32.mxu0 %vm2695_vm6, %v2692_v0  ;;  %v1790_v0 = vld [vmem:[%s3266_s3 + $0x78] sm:$0xff]  ;;  %s1525_s3 = scalar_lea.vmem %s3264_s1, %s1524_s21 }
 0x79d   :  { %v3185_v37 = vsel %vm1771_vm5, %v3143_v15, %v1753_v36  ;;  %2528 = vmatprep.subr.bf16.mxu0 %v2694_v30  ;;  %v2547_v61 = vpack.c.bf16 %v1790_v0, %v1789_v60  ;;  %v1526_v15 = vld [vmem:[%s1525_s3] ss:$8 sm:$0xf] }
 0x7a0   :  { %2530 = vmatpush3.bf16.msra.mxu0 %v2529_v28 }
 0x7a1   :  { %2531 = vmatprep.subr.bf16.mxu0 %v2694_v30 }
 0x7a4   :  { %2533 = vmatpush3.bf16.msra.mxu0 %v2532_v29 }
 0x7a5   :  { %2534 = vmatprep.subr.bf16.mxu0 %v2694_v30 }
 0x7a8   :  { %2536 = vmatpush3.bf16.msra.mxu0 %v2535_v33 }
 0x7a9   :  { %2537 = vmatprep.subr.bf16.mxu0 %v2694_v30 }
 0x7ac   :  { %2539 = vmatpush3.bf16.msra.mxu0 %v2538_v8 }
 0x7ad   :  { %2540 = vmatprep.subr.bf16.mxu0 %v2694_v30 }
 0x7b0   :  { %2542 = vmatpush3.bf16.msra.mxu0 %v2541_v50 }
 0x7b1   :  { %2543 = vmatprep.subr.bf16.mxu0 %v2694_v30 }
 0x7b4   :  { %2545 = vmatpush3.bf16.msra.mxu0 %v2544_v59 }
 0x7b5   :  { %2546 = vmatprep.subr.bf16.mxu0 %v2694_v30 }
 0x7b8   :  { %2548 = vmatpush3.bf16.msra.mxu0 %v2547_v61 }
 0x86e   :  { %v1593_v62 = vpop.f32.mrb[14].mxu0  ;;  %v1664_v3 = vpop.f32.mrb[14].mxu1 }
 0x86f   :  { %v1595_v5 = vpop.f32.mrb[15].mxu0  ;;  %v1666_v6 = vpop.f32.mrb[15].mxu1 }
 0x870   :  { %v1673_v10 = vcombine.low %v1593_v62, %v1595_v5  ;;  %v1674_v11 = vcombine.low %v1664_v3, %v1666_v6 }
 0x872   :  { %v1681_v12 = vrot.slane %v1673_v10, %v2881_v58  ;;  %v1688_v14 = vrot.slane %v1674_v11, %v2881_v58 }
 0x874   :  { %v1689_v21 = vcombine.low %v1681_v12, %v1688_v14 }
 0x876   :  { %v1696_v9 = vrot.slane %v1689_v21, %v2881_v58 }
 0x878   :  { %v1698_v13 = vadd.f32 %v1696_v9, %v1526_v15 }
 0x87a   :  { %v1951_v17 = vmul.f32 -1.442695, %v1698_v13 }
 0x87c   :  { %2614 = vpow2.f32 %v1951_v17 }
 0x87d   :  { %2616 = vtanh.f32 %v1698_v13 }
 0x886   :  { %v2615_v18 = vpop.eup %2614 }
 0x887   :  { %v1702_v22 = vadd.f32 1.0, %v2615_v18  ;;  %v2617_v26 = vpop.eup %2616 }
 0x888   :  { %v1711_v35 = vrot.slane %v2617_v26, 2 }
 0x889   :  { %2618 = vrcp.f32 %v1702_v22 }
 0x893   :  { %v2619_v27 = vpop.eup %2618 }
 0x894   :  { %v1707_v31 = vrot.slane %v2619_v27, 1  ;;  %v1713_v40 = vmul.f32 %v2619_v27, %v1711_v35  ;;  %v1716_v51 = vrot.slane %v2619_v27, 3 }
 0x896   :  { %v1709_v39 = vmul.f32 %v1707_v31, %v3180_v19 }
 0x898   :  { %v1714_v44 = vadd.f32 %v1713_v40, %v1709_v39 }
 0x89a   :  { %2620 = vtanh.f32 %v1714_v44 }
 0x8a4   :  { %v2621_v52 = vpop.eup %2620 }
 0x8a5   :  { %v1718_v53 = vmul.f32 %v2621_v52, %v1716_v51 }
 0x8a7   :  { %v1759_v58 = vrot.slane %v1718_v53, %v2989_v24 }
 0x8a9   :  { %v1774_v57 = vsel %vm1773_vm7, %v3185_v37, %v1759_v58 }
 0x8aa   :  { %2011 = vmatmul.mubr.f32.vlgmr.msra.gmra.mrb[16].mxu0 %v1774_v57 }
 0x97d   :  { %v1864_v1 = vpop.f32.mrb[16].mxu0 }
 0x97e   :  { %v1865_v2 = vadd.f32 %v1952_v63, %v1864_v1  ;;  %v2012_v7 = vpop.f32.mrb[17].mxu0 }
 0x980   :  { %v1869_v16 = vsel %vm1868_vm8, %v1865_v2, -inf }
 0x981   :  { %1870 = vmax.xlane.f32.xlu0 %v1869_v16 }
 0xa0e   :  { %v1871_v19 = vpop.xlane.xlu0 %1870 }
 0xa0f   :  { %v1872_v20 = vsub.f32 %v1865_v2, %v1871_v19 }
 0xa11   :  { %v1873_v25 = vmul.f32 1.442695, %v1872_v20 }
 0xa13   :  { %2622 = vpow2.f32 %v1873_v25 }
 0xa1d   :  { %v2623_v34 = vpop.eup %2622 }
 0xa1e   :  { %v1875_v24 = vsel %vm1868_vm8, %v2623_v34, 0.0 }
 0xa1f   :  { %1876 = vadd.xlane.f32.xlu0 %v1875_v24 }
 0xaac   :  { %v1877_v36 = vpop.xlane.xlu0 %1876 }
 0xaad   :  { %2624 = vlog2.f32 %v1877_v36 }
 0xab7   :  { %v2625_v37 = vpop.eup %2624 }
 0xab8   :  { %v1879_v42 = vmul.f32 0.6931472, %v2625_v37 }
 0xaba   :  { %v1880_v46 = vsub.f32 %v1872_v20, %v1879_v42 }
 0xabc   :  { %1881 = vst.msk [vmem:[#allocation7] sm:$0xff] %vm1868_vm8, %v1880_v46 }
 0xabd   :  { %2671 = shalt.err (!%p2668_p3)
}
 0xabe   :  { %s2672_s28 = scalar_lea.hbm %s3268_s5, 128 }
 0xabf   :  { %p2673_p4 = scmp.ne.s32.totalorder %s3268_s5, %s2672_s28  ;;  %p2676_p5 = scmp.lt.u32.totalorder %s2672_s28, %s3268_s5 }
 0xac1   :  { %p2678_p6 = pnand %p2676_p5, %p2673_p4 }
 0xac3   :  { %2681 = shalt.err (!%p2678_p6)
}
 0xac4   :  { %1891 = dma.vmem_to_hbm [thread:$0]  %s1889_s4, 128, %s3268_s5, [#allocation6]  }
 0xac5   :  { %2686 = dma.done.wait [#allocation6], 128  }
 0xac6   :  { %2687 = vsyncadd [#allocation6], 4294967168 }
 0xac7   :  { %1895 = vsyncpa [#allocation5], 1 }
 0xac8   :  { %1896 = vsyncpa [#allocation6], 1 }

</bundles_post_ra>
